<compile_context>
chip_gen: v7x
topology: tpu7x:2x2x1
jax: 0.10.0
libtpu: 0.0.40
codegen_flags: <defaults>
</compile_context>

<pallas_src>
import math

import jax
import jax.numpy as jnp
from jax.experimental import pallas as pl
from jax.experimental.pallas import tpu as pltpu


def _physical_vmem_bytes():
    try:
        return int(pltpu.get_tpu_info().vmem_capacity_bytes)
    except Exception:
        return 64 * 2**20  # conservative: v7x per-TensorCore VMEM


def _target_rows_per_step():
    try:
        kind = jax.devices()[0].device_kind.lower()
    except Exception:
        kind = ""
    # v5e MXU is 128-wide (4x128^2) -> 128 rows already saturate M; v6e/v7x use 256.
    if "v5 lite" in kind or "v5e" in kind or "v5lite" in kind:
        return 128
    return 256


def make_encoder_block(B, S, D, H, F, *, eps=1e-5, tb=None, single_buffer_weights=True):
    """Builds a pallas_call for the two residual sublayers, grid over batch tiles."""
    assert D % H == 0
    DK = D // H
    FMAX = max(D, F)

    if tb is None:
        rows = _target_rows_per_step()
        tb = max(1, min(B, max(1, rows // S)))
        while B % tb:
            tb -= 1
        # Keep >= 2 grid steps so the "parallel" axis can shard over v7x's 2 TCs.
        if B >= 2 and B // tb < 2:
            tb = max(1, B // 2)
            while B % tb:
                tb -= 1
    N = tb * S
    grid = (B // tb,)

    # Flash-style key chunking: cap the per-head live score slab at (tb, S, KC) f32.
    KC = 512
    kc = KC if (S > KC and S % KC == 0) else S
    nkc = S // kc

    def kernel(ln_ref,                 # SMEM (4,): [alpha1, bias1, alpha2, bias2]
               x_ref, mb_ref,
               wqkv_ref, bqkv_ref, wo_ref, w1_ref, w2_ref, bpack_ref,
               o_ref):
        x = x_ref[...].reshape(N, D)               # (N, D) f32 rows for the MXU
        mbias = mb_ref[...]                        # (tb, 1, S) key bias, bcast over q

        bp = bpack_ref[...]                        # (3, FMAX) packed biases (f32)
        bo = bp[0:1, :D]
        b1 = bp[1:2, :F]
        b2 = bp[2:3, :D]

        def layer_norm(v, alpha, bias):
            # Matches the module: unbiased std (ddof=1), divide by (std + eps).
            mean = jnp.mean(v, axis=-1, keepdims=True)
            var = jnp.sum((v - mean) ** 2, axis=-1, keepdims=True) * (1.0 / (D - 1))
            inv = pl.reciprocal(jnp.sqrt(var) + eps, approx=True)   # EUP slot
            return alpha * (v - mean) * inv + bias

        # -------- residual connection 1: x = x + MHA(LN(x)) --------
        xn = layer_norm(x, ln_ref[0], ln_ref[1])
        # 1/sqrt(dk) is pre-folded into the Q columns of wqkv / bqkv in the wrapper.
        qkv = jnp.dot(xn.astype(jnp.bfloat16), wqkv_ref[...],
                      preferred_element_type=jnp.float32) + bqkv_ref[...]
        qkv = qkv.astype(jnp.bfloat16).reshape(tb, S, 3 * D)

        # TODO(synk): when DK is not a multiple of 128, pad each head's Q/K/V columns
        # to 128 lanes in the wrapper to avoid sub-128 lane slicing/concat relayouts.
        head_ctx = []
        for h in range(H):                         # static unrolled loop over heads
            qh = qkv[:, :, h * DK:(h + 1) * DK]                    # (tb, S, DK) bf16
            m = l = acc = None
            for c in range(nkc):                   # online softmax over key chunks
                ks = c * kc
                kh = qkv[:, ks:ks + kc, D + h * DK:D + (h + 1) * DK]
                vh = qkv[:, ks:ks + kc, 2 * D + h * DK:2 * D + (h + 1) * DK]
                s = jnp.einsum('bqd,bkd->bqk', qh, kh,
                               preferred_element_type=jnp.float32)
                s = s + mbias[:, :, ks:ks + kc]    # additive key mask (0 / -1e9)
                # TODO(synk): on v6e/v7x the exp below could run in bf16 for 2x EUP.
                if c == 0:
                    m = jnp.max(s, axis=-1, keepdims=True)
                    p = jnp.exp(s - m)
                    l = jnp.sum(p, axis=-1, keepdims=True)
                    acc = jnp.einsum('bqk,bkd->bqd', p.astype(jnp.bfloat16), vh,
                                     preferred_element_type=jnp.float32)
                else:
                    m_new = jnp.maximum(m, jnp.max(s, axis=-1, keepdims=True))
                    scale = jnp.exp(m - m_new)
                    p = jnp.exp(s - m_new)
                    l = scale * l + jnp.sum(p, axis=-1, keepdims=True)
                    acc = scale * acc + jnp.einsum(
                        'bqk,bkd->bqd', p.astype(jnp.bfloat16), vh,
                        preferred_element_type=jnp.float32)
                    m = m_new
            # Deferred normalization: (tb,S,DK) multiply instead of (tb,S,S).
            head_ctx.append(acc * pl.reciprocal(l, approx=True))

        attn = jnp.concatenate(head_ctx, axis=-1).reshape(N, D)    # dense (N, D)
        attn = jnp.dot(attn.astype(jnp.bfloat16), wo_ref[...],
                       preferred_element_type=jnp.float32) + bo
        x = x + attn                               # residual (dropout = identity)

        # -------- residual connection 2: x = x + FFN(LN(x)) --------
        xn = layer_norm(x, ln_ref[2], ln_ref[3])
        h1 = jnp.dot(xn.astype(jnp.bfloat16), w1_ref[...],
                     preferred_element_type=jnp.float32) + b1
        h1 = jnp.maximum(h1, 0.0)
        ff = jnp.dot(h1.astype(jnp.bfloat16), w2_ref[...],
                     preferred_element_type=jnp.float32) + b2
        o_ref[...] = (x + ff).reshape(tb, S, D)    # single lane-dense store

    full2d = lambda b: (0, 0)

    def weight_spec(shape):
        # Constant index_map -> fetched once; single-buffer to halve resident VMEM.
        if single_buffer_weights:
            return pl.BlockSpec(shape, full2d, pipeline_mode=pl.Buffered(1))
        return pl.BlockSpec(shape, full2d)

    grid_spec = pltpu.PrefetchScalarGridSpec(
        num_scalar_prefetch=0,
        grid=grid,
        in_specs=[
            pl.BlockSpec(memory_space=pltpu.MemorySpace.SMEM),       # ln scalars
            pl.BlockSpec((tb, S, D), lambda b: (b, 0, 0)),           # x
            pl.BlockSpec((tb, 1, S), lambda b: (b, 0, 0)),           # key mask bias
            weight_spec((D, 3 * D)),                                 # Wqkv (bf16)
            weight_spec((1, 3 * D)),                                 # bqkv (f32)
            weight_spec((D, D)),                                     # Wo (bf16)
            weight_spec((D, F)),                                     # W1 (bf16)
            weight_spec((F, D)),                                     # W2 (bf16)
            weight_spec((3, FMAX)),                                  # packed biases
        ],
        out_specs=pl.BlockSpec((tb, S, D), lambda b: (b, 0, 0)),
    )

    # VMEM budget: resident weights, double-buffered x / out / mask blocks, and the
    # dominant in-kernel temporaries (qkv slab, one head's score chunk, activations)
    # with a 2x margin; clamped to 85% of the generation's physical VMEM.
    w_bufs = 1 if single_buffer_weights else 2
    weight_bytes = w_bufs * (2 * (3 * D * D + D * D + 2 * D * F)
                             + 4 * (3 * D + 3 * FMAX))
    io_bytes = 2 * (4 * tb * S * D        # x block
                    + 4 * tb * S * D      # out block
                    + 4 * tb * S)         # mask block
    tmp_bytes = ((4 + 2) * N * 3 * D      # qkv f32 + bf16 copy
                 + 2 * 4 * tb * S * kc    # one head's scores + exp(s), f32
                 + 4 * N * (3 * D + FMAX))  # xn / attn / h1 / ff / residual temps
    vmem_limit = int(min(0.85 * _physical_vmem_bytes(),
                         max(32 * 2**20, weight_bytes + io_bytes + 2 * tmp_bytes)))

    return pl.pallas_call(
        kernel,
        out_shape=jax.ShapeDtypeStruct((B, S, D), jnp.float32),
        grid_spec=grid_spec,
        compiler_params=pltpu.CompilerParams(
            dimension_semantics=("parallel",),
            vmem_limit_bytes=vmem_limit),
    )


def encoder_block_forward(x, mask, params):
    B, S, D = x.shape
    F = params["w1"].shape[1]
    H = params["h"]
    DK = D // H
    FMAX = max(D, F)

    # Fold 1/sqrt(dk) into the Q projection, fuse QKV, cast MXU weights to bf16.
    inv_sqrt_dk = 1.0 / math.sqrt(DK)
    wqkv = jnp.concatenate(
        [params["wq"] * inv_sqrt_dk, params["wk"], params["wv"]], axis=1)
    bqkv = jnp.concatenate(
        [params["bq"] * inv_sqrt_dk, params["bk"], params["bv"]], axis=1)
    bias_pack = jnp.zeros((3, FMAX), jnp.float32)
    bias_pack = bias_pack.at[0, :D].set(params["bo"][0])
    bias_pack = bias_pack.at[1, :F].set(params["b1"][0])
    bias_pack = bias_pack.at[2, :D].set(params["b2"][0])

    # Key-padding mask -> additive (B, 1, S) key bias (0 attend / -1e9 masked).
    # A (B,1,S,S) padding mask is query-independent, so row 0 carries the key mask.
    # (Fully masked rows would differ from masked_fill's uniform softmax; not
    # exercised here.)
    if mask.ndim == 4:
        key_mask = mask[:, 0, 0, :]
    else:
        key_mask = mask.reshape(B, S)
    mask_bias = jnp.where(key_mask == 0.0, -1e9, 0.0).astype(jnp.float32)[:, None, :]

    args = (
        params["ln"].astype(jnp.float32),
        x, mask_bias,
        wqkv.astype(jnp.bfloat16), bqkv.astype(jnp.float32),
        params["wo"].astype(jnp.bfloat16),
        params["w1"].astype(jnp.bfloat16),
        params["w2"].astype(jnp.bfloat16),
        bias_pack,
    )

    try:
        # Preferred config: constant weights single-buffered (pl.Buffered(1)).
        out = make_encoder_block(B, S, D, H, F, single_buffer_weights=True)(*args)
        jax.block_until_ready(out)
        return out
    except Exception:
        # Fallback for runtimes that reject pipeline_mode on constant inputs.
        return make_encoder_block(B, S, D, H, F, single_buffer_weights=False)(*args)


def reference_forward(x, mask, params):
    """Pure-JAX f32 reference mirroring the PyTorch module (eval mode)."""
    eps = 1e-5
    H = params["h"]
    B, S, D = x.shape
    DK = D // H

    def ln(v, alpha, bias):
        mean = v.mean(-1, keepdims=True)
        var = ((v - mean) ** 2).sum(-1, keepdims=True) / (v.shape[-1] - 1)
        return alpha * (v - mean) / (jnp.sqrt(var) + eps) + bias

    a1, c1, a2, c2 = params["ln"]
    xn = ln(x, a1, c1)
    q = xn @ params["wq"] + params["bq"]
    k = xn @ params["wk"] + params["bk"]
    v = xn @ params["wv"] + params["bv"]
    split = lambda t: t.reshape(B, S, H, DK).transpose(0, 2, 1, 3)
    qh, kh, vh = split(q), split(k), split(v)
    scores = jnp.einsum('bhqd,bhkd->bhqk', qh, kh) / math.sqrt(DK)
    scores = jnp.where(mask == 0, -1e9, scores)
    p = jax.nn.softmax(scores, axis=-1)
    ctx = jnp.einsum('bhqk,bhkd->bhqd', p, vh).transpose(0, 2, 1, 3).reshape(B, S, D)
    x = x + (ctx @ params["wo"] + params["bo"])
    xn = ln(x, a2, c2)
    h1 = jnp.maximum(xn @ params["w1"] + params["b1"], 0.0)
    return x + (h1 @ params["w2"] + params["b2"])


if __name__ == "__main__":
    # Small shapes consistent with the module: batch=2, seq=8, d_model=32, h=4, d_ff=64
    B, S, D, H, F = 2, 8, 32, 4, 64
    key = jax.random.PRNGKey(0)
    ks = jax.random.split(key, 12)
    scale = 0.1

    params = {
        "h": H,
        # weights stored (in, out) so the kernel computes x @ W + b.
        "wq": jax.random.normal(ks[0], (D, D), jnp.float32) * scale,
        "bq": jax.random.normal(ks[1], (1, D), jnp.float32) * scale,
        "wk": jax.random.normal(ks[2], (D, D), jnp.float32) * scale,
        "bk": jax.random.normal(ks[3], (1, D), jnp.float32) * scale,
        "wv": jax.random.normal(ks[4], (D, D), jnp.float32) * scale,
        "bv": jax.random.normal(ks[5], (1, D), jnp.float32) * scale,
        "wo": jax.random.normal(ks[6], (D, D), jnp.float32) * scale,
        "bo": jax.random.normal(ks[7], (1, D), jnp.float32) * scale,
        "w1": jax.random.normal(ks[8], (D, F), jnp.float32) * scale,
        "b1": jax.random.normal(ks[9], (1, F), jnp.float32) * scale,
        "w2": jax.random.normal(ks[10], (F, D), jnp.float32) * scale,
        "b2": jnp.zeros((1, D), jnp.float32),
        # LayerNormalization params: alpha=1, bias=0 (per nn.Parameter init), x2 layers
        "ln": jnp.array([1.0, 0.0, 1.0, 0.0], jnp.float32),
    }

    x = jax.random.normal(ks[11], (B, S, D), jnp.float32)
    # padding-style (query-independent) mask: last 2 key positions masked out
    mask = jnp.ones((B, 1, S, S), jnp.float32).at[:, :, :, S - 2:].set(0.0)

    out = encoder_block_forward(x, mask, params)
    jax.block_until_ready(out)
    assert out.shape == (B, S, D) and out.dtype == jnp.float32

    ref = reference_forward(x, mask, params)
    max_err = float(jnp.max(jnp.abs(out - ref)))
    # bf16 MXU operands + approx (EUP) reciprocals -> loose but meaningful tolerance.
    assert max_err < 5e-2, f"max abs error too large: {max_err}"
    print("KERNEL_OK")
</pallas_src>

<mosaic_0001>
module attributes {stable_mosaic.version = 11 : i64} {
  func.func @kernel(%arg0: i32, %arg1: memref<4xf32, #tpu.memory_space<smem>>, %arg2: memref<1x8x32xf32, #tpu.memory_space<vmem>>, %arg3: memref<1x1x8xf32, #tpu.memory_space<vmem>>, %arg4: memref<32x96xbf16, #tpu.memory_space<vmem>>, %arg5: memref<1x96xf32, #tpu.memory_space<vmem>>, %arg6: memref<32x32xbf16, #tpu.memory_space<vmem>>, %arg7: memref<32x64xbf16, #tpu.memory_space<vmem>>, %arg8: memref<64x32xbf16, #tpu.memory_space<vmem>>, %arg9: memref<3x64xf32, #tpu.memory_space<vmem>>, %arg10: memref<1x8x32xf32, #tpu.memory_space<vmem>>) attributes {dimension_semantics = [#tpu.dimension_semantics<parallel>], iteration_bounds = array<i64: 2>, scalar_prefetch = 0 : i64, scratch_operands = 0 : i64, tpu.core_type = #tpu.core_type<tc>, window_params = [{transform_indices = @transform_0, window_bounds = array<i64: 4>}, {transform_indices = @transform_1, window_bounds = array<i64: 1, 8, 32>}, {transform_indices = @transform_2, window_bounds = array<i64: 1, 1, 8>}, {pipeline_mode = #tpu.pipeline_mode<synchronous>, transform_indices = @transform_3, window_bounds = array<i64: 32, 96>}, {pipeline_mode = #tpu.pipeline_mode<synchronous>, transform_indices = @transform_4, window_bounds = array<i64: 1, 96>}, {pipeline_mode = #tpu.pipeline_mode<synchronous>, transform_indices = @transform_5, window_bounds = array<i64: 32, 32>}, {pipeline_mode = #tpu.pipeline_mode<synchronous>, transform_indices = @transform_6, window_bounds = array<i64: 32, 64>}, {pipeline_mode = #tpu.pipeline_mode<synchronous>, transform_indices = @transform_7, window_bounds = array<i64: 64, 32>}, {pipeline_mode = #tpu.pipeline_mode<synchronous>, transform_indices = @transform_8, window_bounds = array<i64: 3, 64>}, {transform_indices = @transform_9, window_bounds = array<i64: 1, 8, 32>}]} {
    %c0 = arith.constant 0 : index
    %c0_0 = arith.constant 0 : index
    %c0_1 = arith.constant 0 : index
    %0 = vector.load %arg2[%c0, %c0_0, %c0_1] : memref<1x8x32xf32, #tpu.memory_space<vmem>>, vector<1x8x32xf32>
    %1 = vector.shape_cast %0 : vector<1x8x32xf32> to vector<8x32xf32>
    %c0_2 = arith.constant 0 : index
    %c0_3 = arith.constant 0 : index
    %c0_4 = arith.constant 0 : index
    %2 = vector.load %arg3[%c0_2, %c0_3, %c0_4] : memref<1x1x8xf32, #tpu.memory_space<vmem>>, vector<1x1x8xf32>
    %c0_5 = arith.constant 0 : index
    %c0_6 = arith.constant 0 : index
    %3 = vector.load %arg9[%c0_5, %c0_6] : memref<3x64xf32, #tpu.memory_space<vmem>>, vector<3x64xf32>
    %4 = vector.extract_strided_slice %3 {offsets = [0, 0], sizes = [1, 32], strides = [1, 1]} : vector<3x64xf32> to vector<1x32xf32>
    %5 = vector.extract_strided_slice %3 {offsets = [1, 0], sizes = [1, 64], strides = [1, 1]} : vector<3x64xf32> to vector<1x64xf32>
    %6 = vector.extract_strided_slice %3 {offsets = [2, 0], sizes = [1, 32], strides = [1, 1]} : vector<3x64xf32> to vector<1x32xf32>
    %c0_7 = arith.constant 0 : index
    %7 = memref.load %arg1[%c0_7] : memref<4xf32, #tpu.memory_space<smem>>
    %c1 = arith.constant 1 : index
    %8 = memref.load %arg1[%c1] : memref<4xf32, #tpu.memory_space<smem>>
    %cst = arith.constant dense<0.000000e+00> : vector<8xf32>
    %9 = vector.multi_reduction <add>, %1, %cst [1] : vector<8x32xf32> to vector<8xf32>
    %10 = vector.shape_cast %9 : vector<8xf32> to vector<8x1xf32>
    %cst_8 = arith.constant 3.200000e+01 : f32
    %11 = vector.broadcast %cst_8 : f32 to vector<8x1xf32>
    %12 = arith.divf %10, %11 : vector<8x1xf32>
    %13 = vector.broadcast %12 : vector<8x1xf32> to vector<8x32xf32>
    %14 = arith.subf %1, %13 : vector<8x32xf32>
    %15 = arith.mulf %14, %14 : vector<8x32xf32>
    %cst_9 = arith.constant dense<0.000000e+00> : vector<8xf32>
    %16 = vector.multi_reduction <add>, %15, %cst_9 [1] : vector<8x32xf32> to vector<8xf32>
    %17 = vector.shape_cast %16 : vector<8xf32> to vector<8x1xf32>
    %cst_10 = arith.constant 0.0322580636 : f32
    %18 = vector.broadcast %cst_10 : f32 to vector<8x1xf32>
    %19 = arith.mulf %17, %18 : vector<8x1xf32>
    %20 = math.sqrt %19 : vector<8x1xf32>
    %cst_11 = arith.constant 9.99999974E-6 : f32
    %21 = vector.broadcast %cst_11 : f32 to vector<8x1xf32>
    %22 = arith.addf %20, %21 : vector<8x1xf32>
    %23 = tpu.reciprocal %22 {approx = true} : vector<8x1xf32> -> vector<8x1xf32>
    %24 = vector.broadcast %12 : vector<8x1xf32> to vector<8x32xf32>
    %25 = arith.subf %1, %24 : vector<8x32xf32>
    %26 = vector.broadcast %7 : f32 to vector<8x32xf32>
    %27 = arith.mulf %26, %25 : vector<8x32xf32>
    %28 = vector.broadcast %23 : vector<8x1xf32> to vector<8x32xf32>
    %29 = arith.mulf %27, %28 : vector<8x32xf32>
    %30 = vector.broadcast %8 : f32 to vector<8x32xf32>
    %31 = arith.addf %29, %30 : vector<8x32xf32>
    %32 = arith.truncf %31 : vector<8x32xf32> to vector<8x32xbf16>
    %c0_12 = arith.constant 0 : index
    %c0_13 = arith.constant 0 : index
    %33 = vector.load %arg4[%c0_12, %c0_13] : memref<32x96xbf16, #tpu.memory_space<vmem>>, vector<32x96xbf16>
    %cst_14 = arith.constant dense<0.000000e+00> : vector<8x96xf32>
    %34 = tpu.matmul %32, %33, %cst_14 {dimension_numbers = #tpu.dot_dimension_numbers<[1], [0], [0], [1], [0, 0, 1, 1], [], []>} : vector<8x32xbf16>, vector<32x96xbf16>, vector<8x96xf32> -> vector<8x96xf32>
    %c0_15 = arith.constant 0 : index
    %c0_16 = arith.constant 0 : index
    %35 = vector.load %arg5[%c0_15, %c0_16] : memref<1x96xf32, #tpu.memory_space<vmem>>, vector<1x96xf32>
    %36 = vector.broadcast %35 : vector<1x96xf32> to vector<8x96xf32>
    %37 = arith.addf %34, %36 : vector<8x96xf32>
    %38 = arith.truncf %37 : vector<8x96xf32> to vector<8x96xbf16>
    %39 = vector.shape_cast %38 : vector<8x96xbf16> to vector<1x8x96xbf16>
    %40 = vector.extract_strided_slice %39 {offsets = [0, 0, 0], sizes = [1, 8, 8], strides = [1, 1, 1]} : vector<1x8x96xbf16> to vector<1x8x8xbf16>
    %41 = vector.extract_strided_slice %39 {offsets = [0, 0, 32], sizes = [1, 8, 8], strides = [1, 1, 1]} : vector<1x8x96xbf16> to vector<1x8x8xbf16>
    %42 = vector.extract_strided_slice %39 {offsets = [0, 0, 64], sizes = [1, 8, 8], strides = [1, 1, 1]} : vector<1x8x96xbf16> to vector<1x8x8xbf16>
    "tpu.trace_start"() <{level = 10 : i32, message = "bqd,bkd->bqk"}> : () -> ()
    %cst_17 = arith.constant dense<0.000000e+00> : vector<1x8x8xf32>
    %43 = tpu.matmul %40, %41, %cst_17 {dimension_numbers = #tpu.dot_dimension_numbers<[2], [2], [1], [1], [0, 0, 0, 1, 1, 1], [0], [0]>} : vector<1x8x8xbf16>, vector<1x8x8xbf16>, vector<1x8x8xf32> -> vector<1x8x8xf32>
    "tpu.trace_stop"() : () -> ()
    %44 = vector.broadcast %2 : vector<1x1x8xf32> to vector<1x8x8xf32>
    %45 = arith.addf %43, %44 : vector<1x8x8xf32>
    %cst_18 = arith.constant dense<0xFF800000> : vector<1x8xf32>
    %46 = vector.multi_reduction <maximumf>, %45, %cst_18 [2] : vector<1x8x8xf32> to vector<1x8xf32>
    %47 = vector.shape_cast %46 : vector<1x8xf32> to vector<1x8x1xf32>
    %48 = vector.broadcast %47 : vector<1x8x1xf32> to vector<1x8x8xf32>
    %49 = arith.subf %45, %48 : vector<1x8x8xf32>
    %50 = math.exp %49 : vector<1x8x8xf32>
    %cst_19 = arith.constant dense<0.000000e+00> : vector<1x8xf32>
    %51 = vector.multi_reduction <add>, %50, %cst_19 [2] : vector<1x8x8xf32> to vector<1x8xf32>
    %52 = vector.shape_cast %51 : vector<1x8xf32> to vector<1x8x1xf32>
    %53 = arith.truncf %50 : vector<1x8x8xf32> to vector<1x8x8xbf16>
    "tpu.trace_start"() <{level = 10 : i32, message = "bqk,bkd->bqd"}> : () -> ()
    %cst_20 = arith.constant dense<0.000000e+00> : vector<1x8x8xf32>
    %54 = tpu.matmul %53, %42, %cst_20 {dimension_numbers = #tpu.dot_dimension_numbers<[2], [1], [1], [2], [0, 0, 0, 1, 1, 2], [0], [0]>} : vector<1x8x8xbf16>, vector<1x8x8xbf16>, vector<1x8x8xf32> -> vector<1x8x8xf32>
    "tpu.trace_stop"() : () -> ()
    %55 = tpu.reciprocal %52 {approx = true} : vector<1x8x1xf32> -> vector<1x8x1xf32>
    %56 = vector.broadcast %55 : vector<1x8x1xf32> to vector<1x8x8xf32>
    %57 = arith.mulf %54, %56 : vector<1x8x8xf32>
    %58 = vector.extract_strided_slice %39 {offsets = [0, 0, 8], sizes = [1, 8, 8], strides = [1, 1, 1]} : vector<1x8x96xbf16> to vector<1x8x8xbf16>
    %59 = vector.extract_strided_slice %39 {offsets = [0, 0, 40], sizes = [1, 8, 8], strides = [1, 1, 1]} : vector<1x8x96xbf16> to vector<1x8x8xbf16>
    %60 = vector.extract_strided_slice %39 {offsets = [0, 0, 72], sizes = [1, 8, 8], strides = [1, 1, 1]} : vector<1x8x96xbf16> to vector<1x8x8xbf16>
    "tpu.trace_start"() <{level = 10 : i32, message = "bqd,bkd->bqk"}> : () -> ()
    %cst_21 = arith.constant dense<0.000000e+00> : vector<1x8x8xf32>
    %61 = tpu.matmul %58, %59, %cst_21 {dimension_numbers = #tpu.dot_dimension_numbers<[2], [2], [1], [1], [0, 0, 0, 1, 1, 1], [0], [0]>} : vector<1x8x8xbf16>, vector<1x8x8xbf16>, vector<1x8x8xf32> -> vector<1x8x8xf32>
    "tpu.trace_stop"() : () -> ()
    %62 = vector.broadcast %2 : vector<1x1x8xf32> to vector<1x8x8xf32>
    %63 = arith.addf %61, %62 : vector<1x8x8xf32>
    %cst_22 = arith.constant dense<0xFF800000> : vector<1x8xf32>
    %64 = vector.multi_reduction <maximumf>, %63, %cst_22 [2] : vector<1x8x8xf32> to vector<1x8xf32>
    %65 = vector.shape_cast %64 : vector<1x8xf32> to vector<1x8x1xf32>
    %66 = vector.broadcast %65 : vector<1x8x1xf32> to vector<1x8x8xf32>
    %67 = arith.subf %63, %66 : vector<1x8x8xf32>
    %68 = math.exp %67 : vector<1x8x8xf32>
    %cst_23 = arith.constant dense<0.000000e+00> : vector<1x8xf32>
    %69 = vector.multi_reduction <add>, %68, %cst_23 [2] : vector<1x8x8xf32> to vector<1x8xf32>
    %70 = vector.shape_cast %69 : vector<1x8xf32> to vector<1x8x1xf32>
    %71 = arith.truncf %68 : vector<1x8x8xf32> to vector<1x8x8xbf16>
    "tpu.trace_start"() <{level = 10 : i32, message = "bqk,bkd->bqd"}> : () -> ()
    %cst_24 = arith.constant dense<0.000000e+00> : vector<1x8x8xf32>
    %72 = tpu.matmul %71, %60, %cst_24 {dimension_numbers = #tpu.dot_dimension_numbers<[2], [1], [1], [2], [0, 0, 0, 1, 1, 2], [0], [0]>} : vector<1x8x8xbf16>, vector<1x8x8xbf16>, vector<1x8x8xf32> -> vector<1x8x8xf32>
    "tpu.trace_stop"() : () -> ()
    %73 = tpu.reciprocal %70 {approx = true} : vector<1x8x1xf32> -> vector<1x8x1xf32>
    %74 = vector.broadcast %73 : vector<1x8x1xf32> to vector<1x8x8xf32>
    %75 = arith.mulf %72, %74 : vector<1x8x8xf32>
    %76 = vector.extract_strided_slice %39 {offsets = [0, 0, 16], sizes = [1, 8, 8], strides = [1, 1, 1]} : vector<1x8x96xbf16> to vector<1x8x8xbf16>
    %77 = vector.extract_strided_slice %39 {offsets = [0, 0, 48], sizes = [1, 8, 8], strides = [1, 1, 1]} : vector<1x8x96xbf16> to vector<1x8x8xbf16>
    %78 = vector.extract_strided_slice %39 {offsets = [0, 0, 80], sizes = [1, 8, 8], strides = [1, 1, 1]} : vector<1x8x96xbf16> to vector<1x8x8xbf16>
    "tpu.trace_start"() <{level = 10 : i32, message = "bqd,bkd->bqk"}> : () -> ()
    %cst_25 = arith.constant dense<0.000000e+00> : vector<1x8x8xf32>
    %79 = tpu.matmul %76, %77, %cst_25 {dimension_numbers = #tpu.dot_dimension_numbers<[2], [2], [1], [1], [0, 0, 0, 1, 1, 1], [0], [0]>} : vector<1x8x8xbf16>, vector<1x8x8xbf16>, vector<1x8x8xf32> -> vector<1x8x8xf32>
    "tpu.trace_stop"() : () -> ()
    %80 = vector.broadcast %2 : vector<1x1x8xf32> to vector<1x8x8xf32>
    %81 = arith.addf %79, %80 : vector<1x8x8xf32>
    %cst_26 = arith.constant dense<0xFF800000> : vector<1x8xf32>
    %82 = vector.multi_reduction <maximumf>, %81, %cst_26 [2] : vector<1x8x8xf32> to vector<1x8xf32>
    %83 = vector.shape_cast %82 : vector<1x8xf32> to vector<1x8x1xf32>
    %84 = vector.broadcast %83 : vector<1x8x1xf32> to vector<1x8x8xf32>
    %85 = arith.subf %81, %84 : vector<1x8x8xf32>
    %86 = math.exp %85 : vector<1x8x8xf32>
    %cst_27 = arith.constant dense<0.000000e+00> : vector<1x8xf32>
    %87 = vector.multi_reduction <add>, %86, %cst_27 [2] : vector<1x8x8xf32> to vector<1x8xf32>
    %88 = vector.shape_cast %87 : vector<1x8xf32> to vector<1x8x1xf32>
    %89 = arith.truncf %86 : vector<1x8x8xf32> to vector<1x8x8xbf16>
    "tpu.trace_start"() <{level = 10 : i32, message = "bqk,bkd->bqd"}> : () -> ()
    %cst_28 = arith.constant dense<0.000000e+00> : vector<1x8x8xf32>
    %90 = tpu.matmul %89, %78, %cst_28 {dimension_numbers = #tpu.dot_dimension_numbers<[2], [1], [1], [2], [0, 0, 0, 1, 1, 2], [0], [0]>} : vector<1x8x8xbf16>, vector<1x8x8xbf16>, vector<1x8x8xf32> -> vector<1x8x8xf32>
    "tpu.trace_stop"() : () -> ()
    %91 = tpu.reciprocal %88 {approx = true} : vector<1x8x1xf32> -> vector<1x8x1xf32>
    %92 = vector.broadcast %91 : vector<1x8x1xf32> to vector<1x8x8xf32>
    %93 = arith.mulf %90, %92 : vector<1x8x8xf32>
    %94 = vector.extract_strided_slice %39 {offsets = [0, 0, 24], sizes = [1, 8, 8], strides = [1, 1, 1]} : vector<1x8x96xbf16> to vector<1x8x8xbf16>
    %95 = vector.extract_strided_slice %39 {offsets = [0, 0, 56], sizes = [1, 8, 8], strides = [1, 1, 1]} : vector<1x8x96xbf16> to vector<1x8x8xbf16>
    %96 = vector.extract_strided_slice %39 {offsets = [0, 0, 88], sizes = [1, 8, 8], strides = [1, 1, 1]} : vector<1x8x96xbf16> to vector<1x8x8xbf16>
    "tpu.trace_start"() <{level = 10 : i32, message = "bqd,bkd->bqk"}> : () -> ()
    %cst_29 = arith.constant dense<0.000000e+00> : vector<1x8x8xf32>
    %97 = tpu.matmul %94, %95, %cst_29 {dimension_numbers = #tpu.dot_dimension_numbers<[2], [2], [1], [1], [0, 0, 0, 1, 1, 1], [0], [0]>} : vector<1x8x8xbf16>, vector<1x8x8xbf16>, vector<1x8x8xf32> -> vector<1x8x8xf32>
    "tpu.trace_stop"() : () -> ()
    %98 = vector.broadcast %2 : vector<1x1x8xf32> to vector<1x8x8xf32>
    %99 = arith.addf %97, %98 : vector<1x8x8xf32>
    %cst_30 = arith.constant dense<0xFF800000> : vector<1x8xf32>
    %100 = vector.multi_reduction <maximumf>, %99, %cst_30 [2] : vector<1x8x8xf32> to vector<1x8xf32>
    %101 = vector.shape_cast %100 : vector<1x8xf32> to vector<1x8x1xf32>
    %102 = vector.broadcast %101 : vector<1x8x1xf32> to vector<1x8x8xf32>
    %103 = arith.subf %99, %102 : vector<1x8x8xf32>
    %104 = math.exp %103 : vector<1x8x8xf32>
    %cst_31 = arith.constant dense<0.000000e+00> : vector<1x8xf32>
    %105 = vector.multi_reduction <add>, %104, %cst_31 [2] : vector<1x8x8xf32> to vector<1x8xf32>
    %106 = vector.shape_cast %105 : vector<1x8xf32> to vector<1x8x1xf32>
    %107 = arith.truncf %104 : vector<1x8x8xf32> to vector<1x8x8xbf16>
    "tpu.trace_start"() <{level = 10 : i32, message = "bqk,bkd->bqd"}> : () -> ()
    %cst_32 = arith.constant dense<0.000000e+00> : vector<1x8x8xf32>
    %108 = tpu.matmul %107, %96, %cst_32 {dimension_numbers = #tpu.dot_dimension_numbers<[2], [1], [1], [2], [0, 0, 0, 1, 1, 2], [0], [0]>} : vector<1x8x8xbf16>, vector<1x8x8xbf16>, vector<1x8x8xf32> -> vector<1x8x8xf32>
    "tpu.trace_stop"() : () -> ()
    %109 = tpu.reciprocal %106 {approx = true} : vector<1x8x1xf32> -> vector<1x8x1xf32>
    %110 = vector.broadcast %109 : vector<1x8x1xf32> to vector<1x8x8xf32>
    %111 = arith.mulf %108, %110 : vector<1x8x8xf32>
    %112 = tpu.concatenate %57, %75, %93, %111 in 2 : vector<1x8x8xf32>, vector<1x8x8xf32>, vector<1x8x8xf32>, vector<1x8x8xf32> -> vector<1x8x32xf32>
    %113 = vector.shape_cast %112 : vector<1x8x32xf32> to vector<8x32xf32>
    %114 = arith.truncf %113 : vector<8x32xf32> to vector<8x32xbf16>
    %c0_33 = arith.constant 0 : index
    %c0_34 = arith.constant 0 : index
    %115 = vector.load %arg6[%c0_33, %c0_34] : memref<32x32xbf16, #tpu.memory_space<vmem>>, vector<32x32xbf16>
    %cst_35 = arith.constant dense<0.000000e+00> : vector<8x32xf32>
    %116 = tpu.matmul %114, %115, %cst_35 {dimension_numbers = #tpu.dot_dimension_numbers<[1], [0], [0], [1], [0, 0, 1, 1], [], []>} : vector<8x32xbf16>, vector<32x32xbf16>, vector<8x32xf32> -> vector<8x32xf32>
    %117 = vector.broadcast %4 : vector<1x32xf32> to vector<8x32xf32>
    %118 = arith.addf %116, %117 : vector<8x32xf32>
    %119 = arith.addf %1, %118 : vector<8x32xf32>
    %c2 = arith.constant 2 : index
    %120 = memref.load %arg1[%c2] : memref<4xf32, #tpu.memory_space<smem>>
    %c3 = arith.constant 3 : index
    %121 = memref.load %arg1[%c3] : memref<4xf32, #tpu.memory_space<smem>>
    %cst_36 = arith.constant dense<0.000000e+00> : vector<8xf32>
    %122 = vector.multi_reduction <add>, %119, %cst_36 [1] : vector<8x32xf32> to vector<8xf32>
    %123 = vector.shape_cast %122 : vector<8xf32> to vector<8x1xf32>
    %cst_37 = arith.constant 3.200000e+01 : f32
    %124 = vector.broadcast %cst_37 : f32 to vector<8x1xf32>
    %125 = arith.divf %123, %124 : vector<8x1xf32>
    %126 = vector.broadcast %125 : vector<8x1xf32> to vector<8x32xf32>
    %127 = arith.subf %119, %126 : vector<8x32xf32>
    %128 = arith.mulf %127, %127 : vector<8x32xf32>
    %cst_38 = arith.constant dense<0.000000e+00> : vector<8xf32>
    %129 = vector.multi_reduction <add>, %128, %cst_38 [1] : vector<8x32xf32> to vector<8xf32>
    %130 = vector.shape_cast %129 : vector<8xf32> to vector<8x1xf32>
    %cst_39 = arith.constant 0.0322580636 : f32
    %131 = vector.broadcast %cst_39 : f32 to vector<8x1xf32>
    %132 = arith.mulf %130, %131 : vector<8x1xf32>
    %133 = math.sqrt %132 : vector<8x1xf32>
    %cst_40 = arith.constant 9.99999974E-6 : f32
    %134 = vector.broadcast %cst_40 : f32 to vector<8x1xf32>
    %135 = arith.addf %133, %134 : vector<8x1xf32>
    %136 = tpu.reciprocal %135 {approx = true} : vector<8x1xf32> -> vector<8x1xf32>
    %137 = vector.broadcast %125 : vector<8x1xf32> to vector<8x32xf32>
    %138 = arith.subf %119, %137 : vector<8x32xf32>
    %139 = vector.broadcast %120 : f32 to vector<8x32xf32>
    %140 = arith.mulf %139, %138 : vector<8x32xf32>
    %141 = vector.broadcast %136 : vector<8x1xf32> to vector<8x32xf32>
    %142 = arith.mulf %140, %141 : vector<8x32xf32>
    %143 = vector.broadcast %121 : f32 to vector<8x32xf32>
    %144 = arith.addf %142, %143 : vector<8x32xf32>
    %145 = arith.truncf %144 : vector<8x32xf32> to vector<8x32xbf16>
    %c0_41 = arith.constant 0 : index
    %c0_42 = arith.constant 0 : index
    %146 = vector.load %arg7[%c0_41, %c0_42] : memref<32x64xbf16, #tpu.memory_space<vmem>>, vector<32x64xbf16>
    %cst_43 = arith.constant dense<0.000000e+00> : vector<8x64xf32>
    %147 = tpu.matmul %145, %146, %cst_43 {dimension_numbers = #tpu.dot_dimension_numbers<[1], [0], [0], [1], [0, 0, 1, 1], [], []>} : vector<8x32xbf16>, vector<32x64xbf16>, vector<8x64xf32> -> vector<8x64xf32>
    %148 = vector.broadcast %5 : vector<1x64xf32> to vector<8x64xf32>
    %149 = arith.addf %147, %148 : vector<8x64xf32>
    %cst_44 = arith.constant 0.000000e+00 : f32
    %150 = vector.broadcast %cst_44 : f32 to vector<8x64xf32>
    %151 = arith.maximumf %149, %150 : vector<8x64xf32>
    %152 = arith.truncf %151 : vector<8x64xf32> to vector<8x64xbf16>
    %c0_45 = arith.constant 0 : index
    %c0_46 = arith.constant 0 : index
    %153 = vector.load %arg8[%c0_45, %c0_46] : memref<64x32xbf16, #tpu.memory_space<vmem>>, vector<64x32xbf16>
    %cst_47 = arith.constant dense<0.000000e+00> : vector<8x32xf32>
    %154 = tpu.matmul %152, %153, %cst_47 {dimension_numbers = #tpu.dot_dimension_numbers<[1], [0], [0], [1], [0, 0, 1, 1], [], []>} : vector<8x64xbf16>, vector<64x32xbf16>, vector<8x32xf32> -> vector<8x32xf32>
    %155 = vector.broadcast %6 : vector<1x32xf32> to vector<8x32xf32>
    %156 = arith.addf %154, %155 : vector<8x32xf32>
    %157 = arith.addf %119, %156 : vector<8x32xf32>
    %158 = vector.shape_cast %157 : vector<8x32xf32> to vector<1x8x32xf32>
    %c0_48 = arith.constant 0 : index
    %c0_49 = arith.constant 0 : index
    %c0_50 = arith.constant 0 : index
    %159 = vector.load %arg10[%c0_48, %c0_49, %c0_50] : memref<1x8x32xf32, #tpu.memory_space<vmem>>, vector<1x8x32xf32>
    tpu.vector_store %arg10[%c0_48, %c0_49, %c0_50], %158 {strides = array<i32>} : memref<1x8x32xf32, #tpu.memory_space<vmem>>, vector<1x8x32xf32>,
    return
  }
  func.func @transform_0(%arg0: i32) -> i32 {
    %c0_i32 = arith.constant 0 : i32
    %c0_i32_0 = arith.constant 0 : i32
    return %c0_i32 : i32
  }
  func.func @transform_1(%arg0: i32) -> (i32, i32, i32) {
    %c0_i32 = arith.constant 0 : i32
    %c0_i32_0 = arith.constant 0 : i32
    %c0_i32_1 = arith.constant 0 : i32
    return %arg0, %c0_i32, %c0_i32_0 : i32, i32, i32
  }
  func.func @transform_2(%arg0: i32) -> (i32, i32, i32) {
    %c0_i32 = arith.constant 0 : i32
    %c0_i32_0 = arith.constant 0 : i32
    %c0_i32_1 = arith.constant 0 : i32
    return %arg0, %c0_i32, %c0_i32_0 : i32, i32, i32
  }
  func.func @transform_3(%arg0: i32) -> (i32, i32) {
    %c0_i32 = arith.constant 0 : i32
    %c0_i32_0 = arith.constant 0 : i32
    %c0_i32_1 = arith.constant 0 : i32
    return %c0_i32, %c0_i32_0 : i32, i32
  }
  func.func @transform_4(%arg0: i32) -> (i32, i32) {
    %c0_i32 = arith.constant 0 : i32
    %c0_i32_0 = arith.constant 0 : i32
    %c0_i32_1 = arith.constant 0 : i32
    return %c0_i32, %c0_i32_0 : i32, i32
  }
  func.func @transform_5(%arg0: i32) -> (i32, i32) {
    %c0_i32 = arith.constant 0 : i32
    %c0_i32_0 = arith.constant 0 : i32
    %c0_i32_1 = arith.constant 0 : i32
    return %c0_i32, %c0_i32_0 : i32, i32
  }
  func.func @transform_6(%arg0: i32) -> (i32, i32) {
    %c0_i32 = arith.constant 0 : i32
    %c0_i32_0 = arith.constant 0 : i32
    %c0_i32_1 = arith.constant 0 : i32
    return %c0_i32, %c0_i32_0 : i32, i32
  }
  func.func @transform_7(%arg0: i32) -> (i32, i32) {
    %c0_i32 = arith.constant 0 : i32
    %c0_i32_0 = arith.constant 0 : i32
    %c0_i32_1 = arith.constant 0 : i32
    return %c0_i32, %c0_i32_0 : i32, i32
  }
  func.func @transform_8(%arg0: i32) -> (i32, i32) {
    %c0_i32 = arith.constant 0 : i32
    %c0_i32_0 = arith.constant 0 : i32
    %c0_i32_1 = arith.constant 0 : i32
    return %c0_i32, %c0_i32_0 : i32, i32
  }
  func.func @transform_9(%arg0: i32) -> (i32, i32, i32) {
    %c0_i32 = arith.constant 0 : i32
    %c0_i32_0 = arith.constant 0 : i32
    %c0_i32_1 = arith.constant 0 : i32
    return %arg0, %c0_i32, %c0_i32_0 : i32, i32, i32
  }
}

module attributes {stable_mosaic.version = 11 : i64} {
  func.func @kernel(%arg0: i32, %arg1: memref<4xf32, #tpu.memory_space<smem>>, %arg2: memref<1x8x32xf32, #tpu.memory_space<vmem>>, %arg3: memref<1x1x8xf32, #tpu.memory_space<vmem>>, %arg4: memref<32x96xbf16, #tpu.memory_space<vmem>>, %arg5: memref<1x96xf32, #tpu.memory_space<vmem>>, %arg6: memref<32x32xbf16, #tpu.memory_space<vmem>>, %arg7: memref<32x64xbf16, #tpu.memory_space<vmem>>, %arg8: memref<64x32xbf16, #tpu.memory_space<vmem>>, %arg9: memref<3x64xf32, #tpu.memory_space<vmem>>, %arg10: memref<1x8x32xf32, #tpu.memory_space<vmem>>) attributes {dimension_semantics = [#tpu.dimension_semantics<parallel>], iteration_bounds = array<i64: 2>, scalar_prefetch = 0 : i64, scratch_operands = 0 : i64, tpu.core_type = #tpu.core_type<tc>, window_params = [{transform_indices = @transform_0, window_bounds = array<i64: 4>}, {transform_indices = @transform_1, window_bounds = array<i64: 1, 8, 32>}, {transform_indices = @transform_2, window_bounds = array<i64: 1, 1, 8>}, {pipeline_mode = #tpu.pipeline_mode<synchronous>, transform_indices = @transform_3, window_bounds = array<i64: 32, 96>}, {pipeline_mode = #tpu.pipeline_mode<synchronous>, transform_indices = @transform_4, window_bounds = array<i64: 1, 96>}, {pipeline_mode = #tpu.pipeline_mode<synchronous>, transform_indices = @transform_5, window_bounds = array<i64: 32, 32>}, {pipeline_mode = #tpu.pipeline_mode<synchronous>, transform_indices = @transform_6, window_bounds = array<i64: 32, 64>}, {pipeline_mode = #tpu.pipeline_mode<synchronous>, transform_indices = @transform_7, window_bounds = array<i64: 64, 32>}, {pipeline_mode = #tpu.pipeline_mode<synchronous>, transform_indices = @transform_8, window_bounds = array<i64: 3, 64>}, {transform_indices = @transform_9, window_bounds = array<i64: 1, 8, 32>}]} {
    %c0 = arith.constant 0 : index
    %c0_0 = arith.constant 0 : index
    %c0_1 = arith.constant 0 : index
    %0 = vector.load %arg2[%c0, %c0_0, %c0_1] : memref<1x8x32xf32, #tpu.memory_space<vmem>>, vector<1x8x32xf32>
    %1 = vector.shape_cast %0 : vector<1x8x32xf32> to vector<8x32xf32>
    %c0_2 = arith.constant 0 : index
    %c0_3 = arith.constant 0 : index
    %c0_4 = arith.constant 0 : index
    %2 = vector.load %arg3[%c0_2, %c0_3, %c0_4] : memref<1x1x8xf32, #tpu.memory_space<vmem>>, vector<1x1x8xf32>
    %c0_5 = arith.constant 0 : index
    %c0_6 = arith.constant 0 : index
    %3 = vector.load %arg9[%c0_5, %c0_6] : memref<3x64xf32, #tpu.memory_space<vmem>>, vector<3x64xf32>
    %4 = vector.extract_strided_slice %3 {offsets = [0, 0], sizes = [1, 32], strides = [1, 1]} : vector<3x64xf32> to vector<1x32xf32>
    %5 = vector.extract_strided_slice %3 {offsets = [1, 0], sizes = [1, 64], strides = [1, 1]} : vector<3x64xf32> to vector<1x64xf32>
    %6 = vector.extract_strided_slice %3 {offsets = [2, 0], sizes = [1, 32], strides = [1, 1]} : vector<3x64xf32> to vector<1x32xf32>
    %c0_7 = arith.constant 0 : index
    %7 = memref.load %arg1[%c0_7] : memref<4xf32, #tpu.memory_space<smem>>
    %c1 = arith.constant 1 : index
    %8 = memref.load %arg1[%c1] : memref<4xf32, #tpu.memory_space<smem>>
    %cst = arith.constant dense<0.000000e+00> : vector<8xf32>
    %9 = vector.multi_reduction <add>, %1, %cst [1] : vector<8x32xf32> to vector<8xf32>
    %10 = vector.shape_cast %9 : vector<8xf32> to vector<8x1xf32>
    %cst_8 = arith.constant 3.200000e+01 : f32
    %11 = vector.broadcast %cst_8 : f32 to vector<8x1xf32>
    %12 = arith.divf %10, %11 : vector<8x1xf32>
    %13 = vector.broadcast %12 : vector<8x1xf32> to vector<8x32xf32>
    %14 = arith.subf %1, %13 : vector<8x32xf32>
    %15 = arith.mulf %14, %14 : vector<8x32xf32>
    %cst_9 = arith.constant dense<0.000000e+00> : vector<8xf32>
    %16 = vector.multi_reduction <add>, %15, %cst_9 [1] : vector<8x32xf32> to vector<8xf32>
    %17 = vector.shape_cast %16 : vector<8xf32> to vector<8x1xf32>
    %cst_10 = arith.constant 0.0322580636 : f32
    %18 = vector.broadcast %cst_10 : f32 to vector<8x1xf32>
    %19 = arith.mulf %17, %18 : vector<8x1xf32>
    %20 = math.sqrt %19 : vector<8x1xf32>
    %cst_11 = arith.constant 9.99999974E-6 : f32
    %21 = vector.broadcast %cst_11 : f32 to vector<8x1xf32>
    %22 = arith.addf %20, %21 : vector<8x1xf32>
    %23 = tpu.reciprocal %22 {approx = true} : vector<8x1xf32> -> vector<8x1xf32>
    %24 = vector.broadcast %12 : vector<8x1xf32> to vector<8x32xf32>
    %25 = arith.subf %1, %24 : vector<8x32xf32>
    %26 = vector.broadcast %7 : f32 to vector<8x32xf32>
    %27 = arith.mulf %26, %25 : vector<8x32xf32>
    %28 = vector.broadcast %23 : vector<8x1xf32> to vector<8x32xf32>
    %29 = arith.mulf %27, %28 : vector<8x32xf32>
    %30 = vector.broadcast %8 : f32 to vector<8x32xf32>
    %31 = arith.addf %29, %30 : vector<8x32xf32>
    %32 = arith.truncf %31 : vector<8x32xf32> to vector<8x32xbf16>
    %c0_12 = arith.constant 0 : index
    %c0_13 = arith.constant 0 : index
    %33 = vector.load %arg4[%c0_12, %c0_13] : memref<32x96xbf16, #tpu.memory_space<vmem>>, vector<32x96xbf16>
    %cst_14 = arith.constant dense<0.000000e+00> : vector<8x96xf32>
    %34 = tpu.matmul %32, %33, %cst_14 {dimension_numbers = #tpu.dot_dimension_numbers<[1], [0], [0], [1], [0, 0, 1, 1], [], []>} : vector<8x32xbf16>, vector<32x96xbf16>, vector<8x96xf32> -> vector<8x96xf32>
    %c0_15 = arith.constant 0 : index
    %c0_16 = arith.constant 0 : index
    %35 = vector.load %arg5[%c0_15, %c0_16] : memref<1x96xf32, #tpu.memory_space<vmem>>, vector<1x96xf32>
    %36 = vector.broadcast %35 : vector<1x96xf32> to vector<8x96xf32>
    %37 = arith.addf %34, %36 : vector<8x96xf32>
    %38 = arith.truncf %37 : vector<8x96xf32> to vector<8x96xbf16>
    %39 = vector.shape_cast %38 : vector<8x96xbf16> to vector<1x8x96xbf16>
    %40 = vector.extract_strided_slice %39 {offsets = [0, 0, 0], sizes = [1, 8, 8], strides = [1, 1, 1]} : vector<1x8x96xbf16> to vector<1x8x8xbf16>
    %41 = vector.extract_strided_slice %39 {offsets = [0, 0, 32], sizes = [1, 8, 8], strides = [1, 1, 1]} : vector<1x8x96xbf16> to vector<1x8x8xbf16>
    %42 = vector.extract_strided_slice %39 {offsets = [0, 0, 64], sizes = [1, 8, 8], strides = [1, 1, 1]} : vector<1x8x96xbf16> to vector<1x8x8xbf16>
    "tpu.trace_start"() <{level = 10 : i32, message = "bqd,bkd->bqk"}> : () -> ()
    %cst_17 = arith.constant dense<0.000000e+00> : vector<1x8x8xf32>
    %43 = tpu.matmul %40, %41, %cst_17 {dimension_numbers = #tpu.dot_dimension_numbers<[2], [2], [1], [1], [0, 0, 0, 1, 1, 1], [0], [0]>} : vector<1x8x8xbf16>, vector<1x8x8xbf16>, vector<1x8x8xf32> -> vector<1x8x8xf32>
    "tpu.trace_stop"() : () -> ()
    %44 = vector.broadcast %2 : vector<1x1x8xf32> to vector<1x8x8xf32>
    %45 = arith.addf %43, %44 : vector<1x8x8xf32>
    %cst_18 = arith.constant dense<0xFF800000> : vector<1x8xf32>
    %46 = vector.multi_reduction <maximumf>, %45, %cst_18 [2] : vector<1x8x8xf32> to vector<1x8xf32>
    %47 = vector.shape_cast %46 : vector<1x8xf32> to vector<1x8x1xf32>
    %48 = vector.broadcast %47 : vector<1x8x1xf32> to vector<1x8x8xf32>
    %49 = arith.subf %45, %48 : vector<1x8x8xf32>
    %50 = math.exp %49 : vector<1x8x8xf32>
    %cst_19 = arith.constant dense<0.000000e+00> : vector<1x8xf32>
    %51 = vector.multi_reduction <add>, %50, %cst_19 [2] : vector<1x8x8xf32> to vector<1x8xf32>
    %52 = vector.shape_cast %51 : vector<1x8xf32> to vector<1x8x1xf32>
    %53 = arith.truncf %50 : vector<1x8x8xf32> to vector<1x8x8xbf16>
    "tpu.trace_start"() <{level = 10 : i32, message = "bqk,bkd->bqd"}> : () -> ()
    %cst_20 = arith.constant dense<0.000000e+00> : vector<1x8x8xf32>
    %54 = tpu.matmul %53, %42, %cst_20 {dimension_numbers = #tpu.dot_dimension_numbers<[2], [1], [1], [2], [0, 0, 0, 1, 1, 2], [0], [0]>} : vector<1x8x8xbf16>, vector<1x8x8xbf16>, vector<1x8x8xf32> -> vector<1x8x8xf32>
    "tpu.trace_stop"() : () -> ()
    %55 = tpu.reciprocal %52 {approx = true} : vector<1x8x1xf32> -> vector<1x8x1xf32>
    %56 = vector.broadcast %55 : vector<1x8x1xf32> to vector<1x8x8xf32>
    %57 = arith.mulf %54, %56 : vector<1x8x8xf32>
    %58 = vector.extract_strided_slice %39 {offsets = [0, 0, 8], sizes = [1, 8, 8], strides = [1, 1, 1]} : vector<1x8x96xbf16> to vector<1x8x8xbf16>
    %59 = vector.extract_strided_slice %39 {offsets = [0, 0, 40], sizes = [1, 8, 8], strides = [1, 1, 1]} : vector<1x8x96xbf16> to vector<1x8x8xbf16>
    %60 = vector.extract_strided_slice %39 {offsets = [0, 0, 72], sizes = [1, 8, 8], strides = [1, 1, 1]} : vector<1x8x96xbf16> to vector<1x8x8xbf16>
    "tpu.trace_start"() <{level = 10 : i32, message = "bqd,bkd->bqk"}> : () -> ()
    %cst_21 = arith.constant dense<0.000000e+00> : vector<1x8x8xf32>
    %61 = tpu.matmul %58, %59, %cst_21 {dimension_numbers = #tpu.dot_dimension_numbers<[2], [2], [1], [1], [0, 0, 0, 1, 1, 1], [0], [0]>} : vector<1x8x8xbf16>, vector<1x8x8xbf16>, vector<1x8x8xf32> -> vector<1x8x8xf32>
    "tpu.trace_stop"() : () -> ()
    %62 = vector.broadcast %2 : vector<1x1x8xf32> to vector<1x8x8xf32>
    %63 = arith.addf %61, %62 : vector<1x8x8xf32>
    %cst_22 = arith.constant dense<0xFF800000> : vector<1x8xf32>
    %64 = vector.multi_reduction <maximumf>, %63, %cst_22 [2] : vector<1x8x8xf32> to vector<1x8xf32>
    %65 = vector.shape_cast %64 : vector<1x8xf32> to vector<1x8x1xf32>
    %66 = vector.broadcast %65 : vector<1x8x1xf32> to vector<1x8x8xf32>
    %67 = arith.subf %63, %66 : vector<1x8x8xf32>
    %68 = math.exp %67 : vector<1x8x8xf32>
    %cst_23 = arith.constant dense<0.000000e+00> : vector<1x8xf32>
    %69 = vector.multi_reduction <add>, %68, %cst_23 [2] : vector<1x8x8xf32> to vector<1x8xf32>
    %70 = vector.shape_cast %69 : vector<1x8xf32> to vector<1x8x1xf32>
    %71 = arith.truncf %68 : vector<1x8x8xf32> to vector<1x8x8xbf16>
    "tpu.trace_start"() <{level = 10 : i32, message = "bqk,bkd->bqd"}> : () -> ()
    %cst_24 = arith.constant dense<0.000000e+00> : vector<1x8x8xf32>
    %72 = tpu.matmul %71, %60, %cst_24 {dimension_numbers = #tpu.dot_dimension_numbers<[2], [1], [1], [2], [0, 0, 0, 1, 1, 2], [0], [0]>} : vector<1x8x8xbf16>, vector<1x8x8xbf16>, vector<1x8x8xf32> -> vector<1x8x8xf32>
    "tpu.trace_stop"() : () -> ()
    %73 = tpu.reciprocal %70 {approx = true} : vector<1x8x1xf32> -> vector<1x8x1xf32>
    %74 = vector.broadcast %73 : vector<1x8x1xf32> to vector<1x8x8xf32>
    %75 = arith.mulf %72, %74 : vector<1x8x8xf32>
    %76 = vector.extract_strided_slice %39 {offsets = [0, 0, 16], sizes = [1, 8, 8], strides = [1, 1, 1]} : vector<1x8x96xbf16> to vector<1x8x8xbf16>
    %77 = vector.extract_strided_slice %39 {offsets = [0, 0, 48], sizes = [1, 8, 8], strides = [1, 1, 1]} : vector<1x8x96xbf16> to vector<1x8x8xbf16>
    %78 = vector.extract_strided_slice %39 {offsets = [0, 0, 80], sizes = [1, 8, 8], strides = [1, 1, 1]} : vector<1x8x96xbf16> to vector<1x8x8xbf16>
    "tpu.trace_start"() <{level = 10 : i32, message = "bqd,bkd->bqk"}> : () -> ()
    %cst_25 = arith.constant dense<0.000000e+00> : vector<1x8x8xf32>
    %79 = tpu.matmul %76, %77, %cst_25 {dimension_numbers = #tpu.dot_dimension_numbers<[2], [2], [1], [1], [0, 0, 0, 1, 1, 1], [0], [0]>} : vector<1x8x8xbf16>, vector<1x8x8xbf16>, vector<1x8x8xf32> -> vector<1x8x8xf32>
    "tpu.trace_stop"() : () -> ()
    %80 = vector.broadcast %2 : vector<1x1x8xf32> to vector<1x8x8xf32>
    %81 = arith.addf %79, %80 : vector<1x8x8xf32>
    %cst_26 = arith.constant dense<0xFF800000> : vector<1x8xf32>
    %82 = vector.multi_reduction <maximumf>, %81, %cst_26 [2] : vector<1x8x8xf32> to vector<1x8xf32>
    %83 = vector.shape_cast %82 : vector<1x8xf32> to vector<1x8x1xf32>
    %84 = vector.broadcast %83 : vector<1x8x1xf32> to vector<1x8x8xf32>
    %85 = arith.subf %81, %84 : vector<1x8x8xf32>
    %86 = math.exp %85 : vector<1x8x8xf32>
    %cst_27 = arith.constant dense<0.000000e+00> : vector<1x8xf32>
    %87 = vector.multi_reduction <add>, %86, %cst_27 [2] : vector<1x8x8xf32> to vector<1x8xf32>
    %88 = vector.shape_cast %87 : vector<1x8xf32> to vector<1x8x1xf32>
    %89 = arith.truncf %86 : vector<1x8x8xf32> to vector<1x8x8xbf16>
    "tpu.trace_start"() <{level = 10 : i32, message = "bqk,bkd->bqd"}> : () -> ()
    %cst_28 = arith.constant dense<0.000000e+00> : vector<1x8x8xf32>
    %90 = tpu.matmul %89, %78, %cst_28 {dimension_numbers = #tpu.dot_dimension_numbers<[2], [1], [1], [2], [0, 0, 0, 1, 1, 2], [0], [0]>} : vector<1x8x8xbf16>, vector<1x8x8xbf16>, vector<1x8x8xf32> -> vector<1x8x8xf32>
    "tpu.trace_stop"() : () -> ()
    %91 = tpu.reciprocal %88 {approx = true} : vector<1x8x1xf32> -> vector<1x8x1xf32>
    %92 = vector.broadcast %91 : vector<1x8x1xf32> to vector<1x8x8xf32>
    %93 = arith.mulf %90, %92 : vector<1x8x8xf32>
    %94 = vector.extract_strided_slice %39 {offsets = [0, 0, 24], sizes = [1, 8, 8], strides = [1, 1, 1]} : vector<1x8x96xbf16> to vector<1x8x8xbf16>
    %95 = vector.extract_strided_slice %39 {offsets = [0, 0, 56], sizes = [1, 8, 8], strides = [1, 1, 1]} : vector<1x8x96xbf16> to vector<1x8x8xbf16>
    %96 = vector.extract_strided_slice %39 {offsets = [0, 0, 88], sizes = [1, 8, 8], strides = [1, 1, 1]} : vector<1x8x96xbf16> to vector<1x8x8xbf16>
    "tpu.trace_start"() <{level = 10 : i32, message = "bqd,bkd->bqk"}> : () -> ()
    %cst_29 = arith.constant dense<0.000000e+00> : vector<1x8x8xf32>
    %97 = tpu.matmul %94, %95, %cst_29 {dimension_numbers = #tpu.dot_dimension_numbers<[2], [2], [1], [1], [0, 0, 0, 1, 1, 1], [0], [0]>} : vector<1x8x8xbf16>, vector<1x8x8xbf16>, vector<1x8x8xf32> -> vector<1x8x8xf32>
    "tpu.trace_stop"() : () -> ()
    %98 = vector.broadcast %2 : vector<1x1x8xf32> to vector<1x8x8xf32>
    %99 = arith.addf %97, %98 : vector<1x8x8xf32>
    %cst_30 = arith.constant dense<0xFF800000> : vector<1x8xf32>
    %100 = vector.multi_reduction <maximumf>, %99, %cst_30 [2] : vector<1x8x8xf32> to vector<1x8xf32>
    %101 = vector.shape_cast %100 : vector<1x8xf32> to vector<1x8x1xf32>
    %102 = vector.broadcast %101 : vector<1x8x1xf32> to vector<1x8x8xf32>
    %103 = arith.subf %99, %102 : vector<1x8x8xf32>
    %104 = math.exp %103 : vector<1x8x8xf32>
    %cst_31 = arith.constant dense<0.000000e+00> : vector<1x8xf32>
    %105 = vector.multi_reduction <add>, %104, %cst_31 [2] : vector<1x8x8xf32> to vector<1x8xf32>
    %106 = vector.shape_cast %105 : vector<1x8xf32> to vector<1x8x1xf32>
    %107 = arith.truncf %104 : vector<1x8x8xf32> to vector<1x8x8xbf16>
    "tpu.trace_start"() <{level = 10 : i32, message = "bqk,bkd->bqd"}> : () -> ()
    %cst_32 = arith.constant dense<0.000000e+00> : vector<1x8x8xf32>
    %108 = tpu.matmul %107, %96, %cst_32 {dimension_numbers = #tpu.dot_dimension_numbers<[2], [1], [1], [2], [0, 0, 0, 1, 1, 2], [0], [0]>} : vector<1x8x8xbf16>, vector<1x8x8xbf16>, vector<1x8x8xf32> -> vector<1x8x8xf32>
    "tpu.trace_stop"() : () -> ()
    %109 = tpu.reciprocal %106 {approx = true} : vector<1x8x1xf32> -> vector<1x8x1xf32>
    %110 = vector.broadcast %109 : vector<1x8x1xf32> to vector<1x8x8xf32>
    %111 = arith.mulf %108, %110 : vector<1x8x8xf32>
    %112 = tpu.concatenate %57, %75, %93, %111 in 2 : vector<1x8x8xf32>, vector<1x8x8xf32>, vector<1x8x8xf32>, vector<1x8x8xf32> -> vector<1x8x32xf32>
    %113 = vector.shape_cast %112 : vector<1x8x32xf32> to vector<8x32xf32>
    %114 = arith.truncf %113 : vector<8x32xf32> to vector<8x32xbf16>
    %c0_33 = arith.constant 0 : index
    %c0_34 = arith.constant 0 : index
    %115 = vector.load %arg6[%c0_33, %c0_34] : memref<32x32xbf16, #tpu.memory_space<vmem>>, vector<32x32xbf16>
    %cst_35 = arith.constant dense<0.000000e+00> : vector<8x32xf32>
    %116 = tpu.matmul %114, %115, %cst_35 {dimension_numbers = #tpu.dot_dimension_numbers<[1], [0], [0], [1], [0, 0, 1, 1], [], []>} : vector<8x32xbf16>, vector<32x32xbf16>, vector<8x32xf32> -> vector<8x32xf32>
    %117 = vector.broadcast %4 : vector<1x32xf32> to vector<8x32xf32>
    %118 = arith.addf %116, %117 : vector<8x32xf32>
    %119 = arith.addf %1, %118 : vector<8x32xf32>
    %c2 = arith.constant 2 : index
    %120 = memref.load %arg1[%c2] : memref<4xf32, #tpu.memory_space<smem>>
    %c3 = arith.constant 3 : index
    %121 = memref.load %arg1[%c3] : memref<4xf32, #tpu.memory_space<smem>>
    %cst_36 = arith.constant dense<0.000000e+00> : vector<8xf32>
    %122 = vector.multi_reduction <add>, %119, %cst_36 [1] : vector<8x32xf32> to vector<8xf32>
    %123 = vector.shape_cast %122 : vector<8xf32> to vector<8x1xf32>
    %cst_37 = arith.constant 3.200000e+01 : f32
    %124 = vector.broadcast %cst_37 : f32 to vector<8x1xf32>
    %125 = arith.divf %123, %124 : vector<8x1xf32>
    %126 = vector.broadcast %125 : vector<8x1xf32> to vector<8x32xf32>
    %127 = arith.subf %119, %126 : vector<8x32xf32>
    %128 = arith.mulf %127, %127 : vector<8x32xf32>
    %cst_38 = arith.constant dense<0.000000e+00> : vector<8xf32>
    %129 = vector.multi_reduction <add>, %128, %cst_38 [1] : vector<8x32xf32> to vector<8xf32>
    %130 = vector.shape_cast %129 : vector<8xf32> to vector<8x1xf32>
    %cst_39 = arith.constant 0.0322580636 : f32
    %131 = vector.broadcast %cst_39 : f32 to vector<8x1xf32>
    %132 = arith.mulf %130, %131 : vector<8x1xf32>
    %133 = math.sqrt %132 : vector<8x1xf32>
    %cst_40 = arith.constant 9.99999974E-6 : f32
    %134 = vector.broadcast %cst_40 : f32 to vector<8x1xf32>
    %135 = arith.addf %133, %134 : vector<8x1xf32>
    %136 = tpu.reciprocal %135 {approx = true} : vector<8x1xf32> -> vector<8x1xf32>
    %137 = vector.broadcast %125 : vector<8x1xf32> to vector<8x32xf32>
    %138 = arith.subf %119, %137 : vector<8x32xf32>
    %139 = vector.broadcast %120 : f32 to vector<8x32xf32>
    %140 = arith.mulf %139, %138 : vector<8x32xf32>
    %141 = vector.broadcast %136 : vector<8x1xf32> to vector<8x32xf32>
    %142 = arith.mulf %140, %141 : vector<8x32xf32>
    %143 = vector.broadcast %121 : f32 to vector<8x32xf32>
    %144 = arith.addf %142, %143 : vector<8x32xf32>
    %145 = arith.truncf %144 : vector<8x32xf32> to vector<8x32xbf16>
    %c0_41 = arith.constant 0 : index
    %c0_42 = arith.constant 0 : index
    %146 = vector.load %arg7[%c0_41, %c0_42] : memref<32x64xbf16, #tpu.memory_space<vmem>>, vector<32x64xbf16>
    %cst_43 = arith.constant dense<0.000000e+00> : vector<8x64xf32>
    %147 = tpu.matmul %145, %146, %cst_43 {dimension_numbers = #tpu.dot_dimension_numbers<[1], [0], [0], [1], [0, 0, 1, 1], [], []>} : vector<8x32xbf16>, vector<32x64xbf16>, vector<8x64xf32> -> vector<8x64xf32>
    %148 = vector.broadcast %5 : vector<1x64xf32> to vector<8x64xf32>
    %149 = arith.addf %147, %148 : vector<8x64xf32>
    %cst_44 = arith.constant 0.000000e+00 : f32
    %150 = vector.broadcast %cst_44 : f32 to vector<8x64xf32>
    %151 = arith.maximumf %149, %150 : vector<8x64xf32>
    %152 = arith.truncf %151 : vector<8x64xf32> to vector<8x64xbf16>
    %c0_45 = arith.constant 0 : index
    %c0_46 = arith.constant 0 : index
    %153 = vector.load %arg8[%c0_45, %c0_46] : memref<64x32xbf16, #tpu.memory_space<vmem>>, vector<64x32xbf16>
    %cst_47 = arith.constant dense<0.000000e+00> : vector<8x32xf32>
    %154 = tpu.matmul %152, %153, %cst_47 {dimension_numbers = #tpu.dot_dimension_numbers<[1], [0], [0], [1], [0, 0, 1, 1], [], []>} : vector<8x64xbf16>, vector<64x32xbf16>, vector<8x32xf32> -> vector<8x32xf32>
    %155 = vector.broadcast %6 : vector<1x32xf32> to vector<8x32xf32>
    %156 = arith.addf %154, %155 : vector<8x32xf32>
    %157 = arith.addf %119, %156 : vector<8x32xf32>
    %158 = vector.shape_cast %157 : vector<8x32xf32> to vector<1x8x32xf32>
    %c0_48 = arith.constant 0 : index
    %c0_49 = arith.constant 0 : index
    %c0_50 = arith.constant 0 : index
    %159 = vector.load %arg10[%c0_48, %c0_49, %c0_50] : memref<1x8x32xf32, #tpu.memory_space<vmem>>, vector<1x8x32xf32>
    tpu.vector_store %arg10[%c0_48, %c0_49, %c0_50], %158 {strides = array<i32>} : memref<1x8x32xf32, #tpu.memory_space<vmem>>, vector<1x8x32xf32>,
    return
  }
  func.func @transform_0(%arg0: i32) -> i32 {
    %c0_i32 = arith.constant 0 : i32
    %c0_i32_0 = arith.constant 0 : i32
    return %c0_i32 : i32
  }
  func.func @transform_1(%arg0: i32) -> (i32, i32, i32) {
    %c0_i32 = arith.constant 0 : i32
    %c0_i32_0 = arith.constant 0 : i32
    %c0_i32_1 = arith.constant 0 : i32
    return %arg0, %c0_i32, %c0_i32_0 : i32, i32, i32
  }
  func.func @transform_2(%arg0: i32) -> (i32, i32, i32) {
    %c0_i32 = arith.constant 0 : i32
    %c0_i32_0 = arith.constant 0 : i32
    %c0_i32_1 = arith.constant 0 : i32
    return %arg0, %c0_i32, %c0_i32_0 : i32, i32, i32
  }
  func.func @transform_3(%arg0: i32) -> (i32, i32) {
    %c0_i32 = arith.constant 0 : i32
    %c0_i32_0 = arith.constant 0 : i32
    %c0_i32_1 = arith.constant 0 : i32
    return %c0_i32, %c0_i32_0 : i32, i32
  }
  func.func @transform_4(%arg0: i32) -> (i32, i32) {
    %c0_i32 = arith.constant 0 : i32
    %c0_i32_0 = arith.constant 0 : i32
    %c0_i32_1 = arith.constant 0 : i32
    return %c0_i32, %c0_i32_0 : i32, i32
  }
  func.func @transform_5(%arg0: i32) -> (i32, i32) {
    %c0_i32 = arith.constant 0 : i32
    %c0_i32_0 = arith.constant 0 : i32
    %c0_i32_1 = arith.constant 0 : i32
    return %c0_i32, %c0_i32_0 : i32, i32
  }
  func.func @transform_6(%arg0: i32) -> (i32, i32) {
    %c0_i32 = arith.constant 0 : i32
    %c0_i32_0 = arith.constant 0 : i32
    %c0_i32_1 = arith.constant 0 : i32
    return %c0_i32, %c0_i32_0 : i32, i32
  }
  func.func @transform_7(%arg0: i32) -> (i32, i32) {
    %c0_i32 = arith.constant 0 : i32
    %c0_i32_0 = arith.constant 0 : i32
    %c0_i32_1 = arith.constant 0 : i32
    return %c0_i32, %c0_i32_0 : i32, i32
  }
  func.func @transform_8(%arg0: i32) -> (i32, i32) {
    %c0_i32 = arith.constant 0 : i32
    %c0_i32_0 = arith.constant 0 : i32
    %c0_i32_1 = arith.constant 0 : i32
    return %c0_i32, %c0_i32_0 : i32, i32
  }
  func.func @transform_9(%arg0: i32) -> (i32, i32, i32) {
    %c0_i32 = arith.constant 0 : i32
    %c0_i32_0 = arith.constant 0 : i32
    %c0_i32_1 = arith.constant 0 : i32
    return %arg0, %c0_i32, %c0_i32_0 : i32, i32, i32
  }
}

</mosaic_0001>

<bundles_post_ra>
// kernel: tpu_custom_call.1
= control target key start
LH: loop header
LB: loop body
LE: loop exit
PB: predicated region body
PF: predicated region fallthrough
CT: control target
= control target key end

     0   :  { %14 = vsyncpa [#allocation5], 0  ;;  %s2044_s0 = inlined_call_operand.hbm [shape: f32[4], index: 0, kind: input, shape index: {}]   ;;  %s2045_s1 = inlined_call_operand.vmem [shape: f32[2,8,32], index: 1, kind: input, shape index: {}]   ;;  %s2046_s2 = inlined_call_operand.vmem [shape: f32[2,1,8], index: 2, kind: input, shape index: {}]   ;;  %s2047_s3 = inlined_call_operand.vmem [shape: bf16[32,96], index: 3, kind: input, shape index: {}]   ;;  %s2048_s4 = inlined_call_operand.vmem [shape: f32[1,96], index: 4, kind: input, shape index: {}]   ;;  %s2049_s5 = inlined_call_operand.vmem [shape: bf16[32,32], index: 5, kind: input, shape index: {}]   ;;  %s2050_s6 = inlined_call_operand.hbm [shape: bf16[32,64], index: 6, kind: input, shape index: {}]   ;;  %s2051_s7 = inlined_call_operand.vmem [shape: bf16[64,32], index: 7, kind: input, shape index: {}]   ;;  %s2052_s8 = inlined_call_operand.vmem [shape: f32[3,64], index: 8, kind: input, shape index: {}]   ;;  %s2053_s9 = inlined_call_operand.hbm [shape: f32[2,8,32], index: 9, kind: output, shape index: {}]  }
   0x1   :  { %15 = vsyncpa [#allocation3], 0 }
   0x2   :  { %16 = vsyncpa [#allocation4], 0 }
   0x3   :  { %18 = vsyncpa [#allocation4 + $0x1], 0  ;;  %s1729_s30 = smov 0   ;;  %s1731_s10 = smov 0  }
   0x4   :  { %s1733_s11 = smov 0   ;;  %s1735_s12 = smov 0  }
   0x5 LB: > { %2056 = sst [smem:[#allocation11_spill]] %s1652_s11  ;;  %s1750_s13 = sadd.s32 4294967295, %s1656_s12   ;;  %s1656_s12 = sphi %s1735_s12, %s2071_s12   ;;  %s1652_s11 = sphi %s1733_s11, %s2068_s11   ;;  %s1648_s10 = sphi %s1731_s10, %s2070_s10   ;;  %s1644_s30 = sphi %s1729_s30, %s2069_s30  }
   0x6   : > { %s1278_s14 = sadd.s32 4294967294, %s1656_s12   ;;  %s1754_s15 = sadd.s32 1, %s1656_s12  }
   0x7   : > { %s230_s16 = sadd.s32 1, %s1652_s11  ;;  %s227_s17 = ssub.s32 %s1656_s12, %s1754_s15 }
   0x8   : > { %p240_p0 = scmp.ne.s32.totalorder %s1652_s11, %s1648_s10  ;;  %p228_p1 = scmp.eq.s32.totalorder %s227_s17, 0 }
   0x9   : > { %p241_p2 = scmp.eq.s32.totalorder %s1750_s13, 1  ;;  %p246_p3 = scmp.ne.s32.totalorder %s1648_s10, %s1644_s30 }
   0xa   : > { %p247_p4 = scmp.eq.s32.totalorder %s1278_s14, 1  ;;  %p1279_p7 = scmp.ge.s32.totalorder %s1656_s12, 1 }
   0xb   : > { %s1765_s18 = scalar_select %p228_p1, %s1652_s11, %s230_s16  }
   0xc   : > { %p1767_p5 = por %p241_p2, %p240_p0  ;;  %p1771_p6 = por %p247_p4, %p246_p3 }
   0xd   : > { %2057 = sst [smem:[#allocation12_spill]] %s1765_s18  ;;  %p254_p8 = scmp.lt.s32.totalorder %s1656_s12, 3 }
   0xe   : > { %s2059_s20 = scalar_select %p1771_p6, 1, 0 }
   0xf   : > { %p1777_p9 = pnand %p1279_p7, %p254_p8  ;;  %p2055_p10 = scmp.eq.s32.totalorder %s1750_s13, 0 }
  0x10   : > { %s1658_s22 = smov [#allocation6]   ;;  %s1545_s27 = scalar_lea.hbm %s2044_s0, 16 }
  0x11   : > { %p1443_p11 = pneg %p1777_p9  ;;  %s284_s23 = sshll.u32 %s1658_s22, 4  ;;  %s1790_s23 = int_to_ptr.vmem [resolvable:$true] %s284_s23 }
  0x12   : > { %p1546_p13 = scmp.ne.s32.totalorder %s2044_s0, %s1545_s27  ;;  %p1552_p3 = scmp.lt.u32.totalorder %s1545_s27, %s2044_s0 }
  0x13   : > { %p1786_p12 = pnand %p2055_p10, %p1443_p11 }
  0x15   : > { %p1547_p0 = pneg %p1786_p12 }
  0x17   : > { %p1548_p1 = pnand %p1547_p0, %p1546_p13 }
  0x19   : > { %p1549_p2 = pneg %p1548_p1 }
  0x1b   : > { %p1554_p4 = pnand %p1552_p3, %p1549_p2 }
  0x1d   : > { %1557 = shalt.err (!%p1554_p4)
}
  0x1e   : > { %s1659_s17 = smov [#allocation2]   ;;  %s1558_s29 = scalar_lea.hbm %s2050_s6, 256 }
  0x1f   : > { %1446 = dma.hbm_to_smem (!%p1786_p12), %s2044_s0, 16, %s1659_s17, [#allocation5]  }
  0x20   : > { %p1559_p7 = scmp.ne.s32.totalorder %s2050_s6, %s1558_s29  ;;  %p1565_p13 = scmp.lt.u32.totalorder %s1558_s29, %s2050_s6 }
  0x22   : > { %p1561_p8 = pnand %p1559_p7, %p1547_p0 }
  0x24   : > { %p1562_p11 = pneg %p1561_p8 }
  0x26   : > { %p1567_p1 = pnand %p1565_p13, %p1562_p11 }
  0x28   : > { %1570 = shalt.err (!%p1567_p1)
}
  0x29   : > { %s1571_s16 = scalar_lea.vmem %s1790_s23, 256  ;;  %p1579_p10 = scmp.lt.s32.totalorder %s1790_s23, %s1790_s23 }
  0x2a   : > { %p1572_p2 = scmp.ne.s32.totalorder %s1790_s23, %s1571_s16  ;;  %p1580_p7 = scmp.lt.s32.totalorder %s1571_s16, %s1571_s16 }
  0x2c   : > { %p1574_p3 = pnand %p1572_p2, %p1547_p0  ;;  %p1581_p8 = por %p1580_p7, %p1579_p10 }
  0x2e   : > { %p1575_p4 = pneg %p1574_p3 }
  0x30   : > { %p1582_p6 = pnand %p1581_p8, %p1575_p4 }
  0x32   : > { %1585 = shalt.err (!%p1582_p6)
}
  0x33   : > { %s1660_s11 = smov 64   ;;  %s1661_s18 = smov 4  }
  0x34   : > { %1449 = dma.hbm_to_vmem [thread:$0]  (!%p1786_p12), %s2050_s6, 256, %s1790_s23, [#allocation3], %s1660_s11, %s1660_s11, %s1661_s18  }
  0x35   : > { %319 = sbr.rel (%p1777_p9) target bundleno = 2500 (0x9c4), region = 56  ;;  %p2062_p0 = scmp.eq.s32.totalorder (!%p1777_p9), %s1750_s13, 0 }
  0x3c   : > { %1631 = dma.done.wait (%p2062_p0), [#allocation5], 16   ;;  %p2063_p11 = pmov %p2062_p0 }
  0x3d   : > { %p2064_p6 = pmov %p2062_p0 }
  0x3e   : > { %1633 = vsyncadd (%p2063_p11), [#allocation5], 4294967280 }
  0x3f   : > { %1635 = dma.done.wait (%p2064_p6), [#allocation3], 256   ;;  %p2065_p10 = pmov %p2062_p0 }
  0x41   : > { %1637 = vsyncadd (%p2065_p10), [#allocation3], 4294967040 }
  0x42   : > { %329 = sfence }
  0x43   : > { %p362_p13 = scmp.lt.s32.totalorder %s1750_s13, 1  ;;  %vm375_vm0 = vcmask 261120   ;;  %v1511_v7 = vld [vmem:[%s2047_s3] sm:$0xff]   ;;  %v1662_v8 = vmov 0.0   ;;  %vm1663_vm1 = vmmov 0   ;;  %v1512_v9 = vld [vmem:[%s2047_s3 + $0x8] sm:$0xff]  }
  0x44   : > { %1349 = vmatprep.subr.bf16.mxu0 %v1662_v8  ;;  %1353 = vmatprep.mubr.msk.bf16.mxu0 %vm1663_vm1, %v1662_v8  ;;  %s373_s16 = sld [smem:[#allocation2]]  ;;  %s1288_s11 = sld [smem:[#allocation2 + $0x1]]  ;;  %v1289_v25 = vld [vmem:[%s2048_s4] ss:$0 sm:$0xff]  ;;  %vm478_vm4 = vcmask 64512   ;;  %vm540_vm5 = vcmask 1043456  }
  0x45   : > { %s1848_s23 = scalar_select %p362_p13, %s1750_s13, 1  ;;  %1350 = vmatpush3.bf16.msra.mxu0 %v1511_v7  ;;  %1357 = vmatprep.subr.bf16.mxu1 %v1662_v8  ;;  %vm929_vm6 = vcmask 130048   ;;  %vm931_vm7 = vcmask 195584   ;;  %vm1126_vm10 = vcmask 523264  }
  0x46   : > { %1351 = vmatprep.subr.bf16.mxu0 %v1662_v8  ;;  %1359 = vmatprep.mubr.msk.bf16.mxu1 %vm1663_vm1, %v1662_v8  ;;  %s1664_s22 = smov 120   ;;  %s1666_s24 = smov 88  }
  0x47   : > { %s1287_s21 = sshll.u32 %s1848_s23, 3  ;;  %s1667_s25 = smov 80  }
  0x48   : > { %s365_s26 = scalar_lea.vmem %s2045_s1, %s1287_s21  ;;  %s1665_s21 = smov 96  }
  0x49   : > { %v1854_v0 = vld [vmem:[%s365_s26] sm:$0xff]  ;;  %1352 = vmatpush3.bf16.msra.mxu0 %v1512_v9  ;;  %s1668_s26 = smov 112   ;;  %s1669_s28 = smov 72  }
  0x4a   : > { %v376_v1 = vsel %vm375_vm0, %v1854_v0, 0.0  ;;  %1363 = vmatprep.subr.bf16.mxu0 %v1662_v8  ;;  %v396_v18 = vstv %s373_s16  ;;  %v399_v21 = vstv %s1288_s11  ;;  %s1670_s29 = smov 104   ;;  %s368_s16 = scalar_lea.vmem %s2046_s2, %s1848_s23 }
  0x4b   : > { %377 = vadd.xlane.f32.xlu0 %v376_v1  ;;  %v1293_v43 = vld [vmem:[%s368_s16] ss:$0 sm:$0xff]  ;;  %s1671_s23 = smov 64   ;;  %s1672_s11 = smov 56  }
  0x4c   : > { %s1673_s18 = smov 48   ;;  %s1674_s17 = smov 40  }
  0x4d   : > { %s1316_s27 = sshll.u32 %s1750_s13, 7 }
  0xd8   : > { %v378_v2 = vpop.xlane.xlu0 %377 }
  0xd9   : > { %v380_v3 = vmul.f32 0.03125, %v378_v2 }
  0xdb   : > { %v381_v4 = vsub.f32 %v1854_v0, %v380_v3 }
  0xdd   : > { %v382_v5 = vmul.f32 %v381_v4, %v381_v4  ;;  %v397_v19 = vmul.f32 %v396_v18, %v381_v4 }
  0xdf   : > { %v383_v6 = vsel %vm375_vm0, %v382_v5, 0.0 }
  0xe0   : > { %384 = vadd.xlane.f32.xlu0 %v383_v6 }
 0x16d   : > { %v385_v10 = vpop.xlane.xlu0 %384 }
 0x16e   : > { %v386_v11 = vmul.f32 0.032258064, %v385_v10 }
 0x170   : > { %1521 = vrsqrt.f32 %v386_v11  ;;  %vm389_vm2 = vcmp.eq.f32.partialorder %v386_v11, inf  ;;  %v392_v14 = vand.u32 2147483648, %v386_v11  ;;  %vm391_vm3 = vcmp.eq.f32.partialorder %v386_v11, 0.0 }
 0x17a   : > { %v1522_v12 = vpop.eup %1521 }
 0x17b   : > { %v388_v13 = vmul.f32 %v1522_v12, %v386_v11 }
 0x17d   : > { %v390_v15 = vsel %vm389_vm2, %v386_v11, %v388_v13 }
 0x17e   : > { %v393_v16 = vsel %vm391_vm3, %v392_v14, %v390_v15 }
 0x17f   : > { %v394_v17 = vadd.f32 1e-05, %v393_v16 }
 0x181   : > { %1523 = vrcp.f32 %v394_v17 }
 0x18b   : > { %v1524_v20 = vpop.eup %1523 }
 0x18c   : > { %v398_v22 = vmul.f32 %v1524_v20, %v397_v19 }
 0x18e   : > { %v400_v23 = vadd.f32 %v399_v21, %v398_v22 }
 0x190   : > { %v401_v24 = vpack.c.bf16 %v400_v23, %v400_v23 }
 0x192   : > { %1354 = vmatmul.mubr.msk.bf16.vlgmr.msra.gmra.mrb[0].mxu0 %vm375_vm0, %v401_v24 }
 0x193   : > { %1365 = vmatprep.mubr.msk.bf16.mxu0 %vm1663_vm1, %v1662_v8 }
 0x265   : > { %v462_v26 = vpop.f32.mrb[0].mxu0 }
 0x266   : > { %v463_v27 = vadd.f32 %v1289_v25, %v462_v26  ;;  %v1355_v28 = vpop.f32.mrb[1].mxu0 }
 0x267   : > { %v465_v29 = vpop.f32.mrb[2].mxu0 }
 0x268   : > { %v1880_v30 = vpack.c.bf16 %v463_v27, %v463_v27  ;;  %v1356_v31 = vpop.f32.mrb[3].mxu0 }
 0x26a   : > { %586 = vrot.lane.b32.xlu0 %v1880_v30, %s1664_s22  ;;  %476 = vrot.lane.b32.xlu1 %v1880_v30, %s1665_s21  ;;  %s1675_s22 = smov 8  }
 0x26e   : > { %588 = vrot.lane.b32.xlu1 %v1880_v30, %s1666_s24 }
 0x272   : > { %698 = vrot.lane.b32.xlu1 %v1880_v30, %s1667_s25 }
 0x276   : > { %696 = vrot.lane.b32.xlu1 %v1880_v30, %s1668_s26 }
 0x27a   : > { %808 = vrot.lane.b32.xlu1 %v1880_v30, %s1669_s28  ;;  %s1676_s28 = smov 16  }
 0x27e   : > { %806 = vrot.lane.b32.xlu1 %v1880_v30, %s1670_s29  ;;  %s1677_s29 = smov 24  }
 0x2dc   : > { %v477_v32 = vpop.permute.xlu1 %476  ;;  %v587_v37 = vpop.permute.xlu0 %586 }
 0x2dd   : > { %v483_v33 = vsel %vm478_vm4, %v477_v32, 0 }
 0x2de   : > { %1358 = vmatpush3.bf16.xpose.msra.mxu1 %v483_v33 }
 0x2df   : > { %1369 = vmatprep.subr.bf16.mxu1 %v1662_v8 }
 0x2e0   : > { %v589_v34 = vpop.permute.xlu1 %588 }
 0x2e1   : > { %v594_v35 = vsel %vm478_vm4, %v589_v34, 0 }
 0x2e4   : > { %v699_v36 = vpop.permute.xlu1 %698 }
 0x2e5   : > { %1360 = vmatmul.mubr.msk.bf16.vlgmr.msra.gmra.mrb[0].mxu1 %vm478_vm4, %v1880_v30  ;;  %v704_v39 = vsel %vm478_vm4, %v699_v36, 0 }
 0x2e6   : > { %1370 = vmatpush3.bf16.xpose.msra.mxu1 %v594_v35  ;;  %1371 = vmatprep.mubr.msk.bf16.mxu1 %vm1663_vm1, %v1662_v8 }
 0x2e7   : > { %1381 = vmatprep.subr.bf16.mxu1 %v1662_v8 }
 0x2e8   : > { %v697_v38 = vpop.permute.xlu1 %696 }
 0x2ec   : > { %v809_v40 = vpop.permute.xlu1 %808 }
 0x2ed   : > { %1372 = vmatmul.mubr.msk.bf16.vlgmr.msra.gmra.mrb[4].mxu1 %vm478_vm4, %v587_v37  ;;  %v814_v41 = vsel %vm478_vm4, %v809_v40, 0 }
 0x2ee   : > { %1382 = vmatpush3.bf16.xpose.msra.mxu1 %v704_v39  ;;  %1383 = vmatprep.mubr.msk.bf16.mxu1 %vm1663_vm1, %v1662_v8 }
 0x2ef   : > { %1393 = vmatprep.subr.bf16.mxu1 %v1662_v8 }
 0x2f0   : > { %v807_v42 = vpop.permute.xlu1 %806 }
 0x2f5   : > { %1384 = vmatmul.mubr.msk.bf16.vlgmr.msra.gmra.mrb[8].mxu1 %vm478_vm4, %v697_v38 }
 0x2f6   : > { %1394 = vmatpush3.bf16.xpose.msra.mxu1 %v814_v41  ;;  %1395 = vmatprep.mubr.msk.bf16.mxu1 %vm1663_vm1, %v1662_v8 }
 0x2f7   : > { %1405 = vmatprep.subr.bf16.mxu1 %v1662_v8 }
 0x2fd   : > { %1396 = vmatmul.mubr.msk.bf16.vlgmr.msra.gmra.mrb[12].mxu1 %vm478_vm4, %v807_v42 }
 0x2fe   : > { %1409 = vmatprep.mubr.msk.bf16.mxu1 %vm1663_vm1, %v1662_v8 }
 0x3b8   : > { %v519_v44 = vpop.f32.mrb[0].mxu1 }
 0x3b9   : > { %v520_v45 = vadd.f32 %v1293_v43, %v519_v44  ;;  %v1361_v46 = vpop.f32.mrb[1].mxu1 }
 0x3ba   : > { %v522_v47 = vpop.f32.mrb[2].mxu1 }
 0x3bb   : > { %v1362_v48 = vpop.f32.mrb[3].mxu1  ;;  %v525_v49 = vsel %vm478_vm4, %v520_v45, -inf }
 0x3bc   : > { %526 = vmax.xlane.f32.xlu1 %v525_v49 }
 0x3c0   : > { %v630_v50 = vpop.f32.mrb[4].mxu1 }
 0x3c1   : > { %v631_v51 = vadd.f32 %v1293_v43, %v630_v50  ;;  %v1373_v52 = vpop.f32.mrb[5].mxu1  ;;  %v1513_v50 = vld [vmem:[%s2049_s5] sm:$0xff]  }
 0x3c2   : > { %v633_v53 = vpop.f32.mrb[6].mxu1  ;;  %1406 = vmatpush3.bf16.msra.mxu1 %v1513_v50 }
 0x3c3   : > { %v1374_v54 = vpop.f32.mrb[7].mxu1  ;;  %v636_v55 = vsel %vm478_vm4, %v631_v51, -inf  ;;  %1407 = vmatprep.subr.bf16.mxu1 %v1662_v8 }
 0x3c4   : > { %637 = vmax.xlane.f32.xlu0 %v636_v55 }
 0x3c8   : > { %v740_v56 = vpop.f32.mrb[8].mxu1 }
 0x3c9   : > { %v1385_v57 = vpop.f32.mrb[9].mxu1  ;;  %v741_v3 = vadd.f32 %v1293_v43, %v740_v56 }
 0x3ca   : > { %v743_v58 = vpop.f32.mrb[10].mxu1 }
 0x3cb   : > { %v1386_v59 = vpop.f32.mrb[11].mxu1  ;;  %v746_v4 = vsel %vm478_vm4, %v741_v3, -inf }
 0x3cd   : > { %535 = vrot.lane.b32.xlu1 %v1880_v30, %s1671_s23 }
 0x3d0   : > { %v850_v60 = vpop.f32.mrb[12].mxu1 }
 0x3d1   : > { %v851_v61 = vadd.f32 %v1293_v43, %v850_v60  ;;  %v1397_v62 = vpop.f32.mrb[13].mxu1 }
 0x3d2   : > { %v853_v63 = vpop.f32.mrb[14].mxu1 }
 0x3d3   : > { %v1398_v1 = vpop.f32.mrb[15].mxu1  ;;  %v856_v2 = vsel %vm478_vm4, %v851_v61, -inf }
 0x3d4   : > { %857 = vmax.xlane.f32.xlu0 %v856_v2 }
 0x3ea   : > { %646 = vrot.lane.b32.xlu0 %v1880_v30, %s1672_s11 }
 0x3f1   : > { %747 = vmax.xlane.f32.xlu1 %v746_v4 }
 0x402   : > { %756 = vrot.lane.b32.xlu1 %v1880_v30, %s1673_s18  ;;  %s2001_s18 = scalar_lea.hbm %s2053_s9, %s1316_s27 }
 0x406   : > { %866 = vrot.lane.b32.xlu1 %v1880_v30, %s1674_s17  ;;  %s1305_s17 = sld [smem:[#allocation2 + $0x2]] }
 0x449   : > { %v527_v5 = vpop.xlane.xlu1 %526 }
 0x44a   : > { %v528_v6 = vsub.f32 %v520_v45, %v527_v5 }
 0x44c   : > { %v529_v7 = vmul.f32 1.442695, %v528_v6 }
 0x44d   : > { %v536_v9 = vpop.permute.xlu1 %535 }
 0x44e   : > { %1525 = vpow2.f32 %v529_v7  ;;  %v542_v10 = vsel %vm540_vm5, %v536_v9, 0 }
 0x44f   : > { %1364 = vmatpush3.bf16.msra.mxu0 %v542_v10 }
 0x450   : > { %1375 = vmatprep.subr.bf16.mxu0 %v1662_v8 }
 0x451   : > { %v638_v11 = vpop.xlane.xlu0 %637 }
 0x452   : > { %v639_v12 = vsub.f32 %v631_v51, %v638_v11  ;;  %v1514_v51 = vld [vmem:[%s2049_s5 + $0x8] sm:$0xff]  }
 0x453   : > { %1408 = vmatpush3.bf16.msra.mxu1 %v1514_v51 }
 0x454   : > { %v640_v13 = vmul.f32 1.442695, %v639_v12  ;;  %1421 = vmatprep.subr.bf16.mxu1 %v1662_v8 }
 0x456   : > { %1527 = vpow2.f32 %v640_v13  ;;  %v938_v13 = vlaneseq }
 0x458   : > { %v1526_v14 = vpop.eup %1525 }
 0x459   : > { %v534_v15 = vpack.c.bf16 %v1526_v14, %v1526_v14  ;;  %v531_v26 = vsel %vm478_vm4, %v1526_v14, 0.0  ;;  %v1958_v14 = vshrl.u32 %v938_v13, 7 }
 0x45b   : > { %1366 = vmatmul.mubr.msk.bf16.vlgmr.msra.gmra.mrb[4].mxu0 %vm478_vm4, %v534_v15  ;;  %v940_v15 = vsub.s32 0, %v1958_v14  ;;  %v1031_v50 = vsub.s32 1, %v1958_v14 }
 0x45c   : > { %1377 = vmatprep.mubr.msk.bf16.mxu0 %vm1663_vm1, %v1662_v8 }
 0x460   : > { %v1528_v16 = vpop.eup %1527 }
 0x461   : > { %v858_v17 = vpop.xlane.xlu0 %857  ;;  %v642_v18 = vsel %vm478_vm4, %v1528_v16, 0.0  ;;  %v645_v23 = vpack.c.bf16 %v1528_v16, %v1528_v16  ;;  %v1964_v16 = vld [vmem:[%s2052_s8] sm:$0x7] }
 0x462   : > { %v859_v19 = vsub.f32 %v851_v61, %v858_v17  ;;  %643 = vadd.xlane.f32.xlu0 %v642_v18  ;;  %v941_v17 = vrot.slane %v1964_v16, %v940_v15  ;;  %v1032_v51 = vrot.slane %v1964_v16, %v1031_v50 }
 0x464   : > { %v860_v20 = vmul.f32 1.442695, %v859_v19 }
 0x465   : > { %v647_v21 = vpop.permute.xlu0 %646 }
 0x466   : > { %1529 = vpow2.f32 %v860_v20  ;;  %v652_v22 = vsel %vm540_vm5, %v647_v21, 0 }
 0x467   : > { %1376 = vmatpush3.bf16.msra.mxu0 %v652_v22 }
 0x468   : > { %1387 = vmatprep.subr.bf16.mxu0 %v1662_v8 }
 0x46a   : > { %1378 = vmatmul.mubr.msk.bf16.vlgmr.msra.gmra.mrb[8].mxu0 %vm478_vm4, %v645_v23 }
 0x46b   : > { %1389 = vmatprep.mubr.msk.bf16.mxu0 %vm1663_vm1, %v1662_v8 }
 0x470   : > { %v1530_v24 = vpop.eup %1529 }
 0x471   : > { %v862_v25 = vsel %vm478_vm4, %v1530_v24, 0.0  ;;  %v865_v37 = vpack.c.bf16 %v1530_v24, %v1530_v24 }
 0x472   : > { %863 = vadd.xlane.f32.xlu0 %v862_v25 }
 0x476   : > { %532 = vadd.xlane.f32.xlu0 %v531_v26 }
 0x47e   : > { %v748_v27 = vpop.xlane.xlu1 %747 }
 0x47f   : > { %v749_v28 = vsub.f32 %v741_v3, %v748_v27 }
 0x481   : > { %v750_v29 = vmul.f32 1.442695, %v749_v28 }
 0x482   : > { %v757_v30 = vpop.permute.xlu1 %756 }
 0x483   : > { %1531 = vpow2.f32 %v750_v29  ;;  %v762_v31 = vsel %vm540_vm5, %v757_v30, 0  ;;  %v1515_v30 = vld [vmem:[#allocation6] sm:$0xff]  }
 0x484   : > { %1388 = vmatpush3.bf16.msra.mxu0 %v762_v31  ;;  %v1516_v31 = vld [vmem:[#allocation6 + $0x8] sm:$0xff]  }
 0x485   : > { %1399 = vmatprep.subr.bf16.mxu0 %v1662_v8 }
 0x486   : > { %v867_v33 = vpop.permute.xlu1 %866 }
 0x487   : > { %v872_v36 = vsel %vm540_vm5, %v867_v33, 0 }
 0x48d   : > { %v1532_v32 = vpop.eup %1531 }
 0x48e   : > { %v752_v34 = vsel %vm478_vm4, %v1532_v32, 0.0  ;;  %v755_v35 = vpack.c.bf16 %v1532_v32, %v1532_v32  ;;  %v1518_v32 = vld [vmem:[%s2051_s7 + $0x8] sm:$0xff]  }
 0x48f   : > { %753 = vadd.xlane.f32.xlu1 %v752_v34 }
 0x490   : > { %1390 = vmatmul.mubr.msk.bf16.vlgmr.msra.gmra.mrb[12].mxu0 %vm478_vm4, %v755_v35 }
 0x491   : > { %1400 = vmatpush3.bf16.msra.mxu0 %v872_v36  ;;  %1401 = vmatprep.mubr.msk.bf16.mxu0 %vm1663_vm1, %v1662_v8 }
 0x492   : > { %1413 = vmatprep.subr.bf16.mxu0 %v1662_v8 }
 0x498   : > { %1402 = vmatmul.mubr.msk.bf16.vlgmr.msra.gmra.mrb[16].mxu0 %vm478_vm4, %v865_v37 }
 0x499   : > { %1417 = vmatprep.mubr.msk.bf16.mxu0 %vm1663_vm1, %v1662_v8  ;;  %1414 = vmatpush3.bf16.msra.mxu0 %v1515_v30 }
 0x49a   : > { %1415 = vmatprep.subr.bf16.mxu0 %v1662_v8 }
 0x49d   : > { %1416 = vmatpush3.bf16.msra.mxu0 %v1516_v31 }
 0x4ef   : > { %v644_v40 = vpop.xlane.xlu0 %643 }
 0x4f0   : > { %1533 = vrcp.f32 %v644_v40 }
 0x4fa   : > { %v1534_v43 = vpop.eup %1533 }
 0x4ff   : > { %v864_v52 = vpop.xlane.xlu0 %863 }
 0x503   : > { %v533_v2 = vpop.xlane.xlu0 %532 }
 0x51c   : > { %v754_v49 = vpop.xlane.xlu1 %753 }
 0x51d   : > { %1535 = vrcp.f32 %v754_v49  ;;  %v1520_v49 = vld [vmem:[%s2051_s7 + $0x18] sm:$0xff]  }
 0x51e   : > { %1537 = vrcp.f32 %v864_v52 }
 0x51f   : > { %1539 = vrcp.f32 %v533_v2 }
 0x527   : > { %v1536_v53 = vpop.eup %1535 }
 0x528   : > { %v1538_v59 = vpop.eup %1537 }
 0x529   : > { %v1540_v3 = vpop.eup %1539 }
 0x52e   : > { %v578_v38 = vpop.f32.mrb[4].mxu0 }
 0x52f   : > { %v1367_v39 = vpop.f32.mrb[5].mxu0  ;;  %v585_v5 = vmul.f32 %v1540_v3, %v578_v38 }
 0x530   : > { %v581_v41 = vpop.f32.mrb[6].mxu0 }
 0x531   : > { %v1368_v42 = vpop.f32.mrb[7].mxu0  ;;  %v1019_v41 = vstv %s1305_s17 }
 0x53d   : > { %v688_v44 = vpop.f32.mrb[8].mxu0 }
 0x53e   : > { %v695_v45 = vmul.f32 %v1534_v43, %v688_v44  ;;  %v1379_v46 = vpop.f32.mrb[9].mxu0 }
 0x53f   : > { %v691_v47 = vpop.f32.mrb[10].mxu0 }
 0x540   : > { %917 = vrot.lane.b32.xlu1 %v695_v45, %s1675_s22  ;;  %v1380_v48 = vpop.f32.mrb[11].mxu0  ;;  %s1306_s22 = sld [smem:[#allocation2 + $0x3]] }
 0x541   : > { %v1519_v48 = vld [vmem:[%s2051_s7 + $0x10] sm:$0xff]  }
 0x546   : > { %v1022_v44 = vstv %s1306_s22  ;;  %s1678_s22 = smov [#allocation7]  }
 0x547   : > { %s1590_s21 = sshll.u32 %s1678_s22, 4  ;;  %s1591_s21 = int_to_ptr.vmem [resolvable:$false] %s1590_s21 }
 0x548   : > { %s1592_s24 = scalar_lea.vmem %s1591_s21, 256 }
 0x563   : > { %v798_v54 = vpop.f32.mrb[12].mxu0 }
 0x564   : > { %v805_v55 = vmul.f32 %v1536_v53, %v798_v54  ;;  %v1391_v56 = vpop.f32.mrb[13].mxu0 }
 0x565   : > { %v801_v57 = vpop.f32.mrb[14].mxu0 }
 0x566   : > { %921 = vrot.lane.b32.xlu0 %v805_v55, %s1676_s28  ;;  %v1392_v58 = vpop.f32.mrb[15].mxu0  ;;  %s359_s28 = sand.u32 1, %s1648_s10  }
 0x567   : > { %s1173_s13 = scalar_lea.sflag [#allocation4], %s359_s28 }
 0x56b   : > { %v908_v60 = vpop.f32.mrb[16].mxu0 }
 0x56c   : > { %v915_v61 = vmul.f32 %v1538_v59, %v908_v60  ;;  %v1403_v62 = vpop.f32.mrb[17].mxu0 }
 0x56d   : > { %v911_v63 = vpop.f32.mrb[18].mxu0 }
 0x56e   : > { %925 = vrot.lane.b32.xlu1 %v915_v61, %s1677_s29  ;;  %v1404_v1 = vpop.f32.mrb[19].mxu0  ;;  %s1286_s29 = sshll.u32 %s359_s28, 3 }
 0x56f   : > { %s361_s14 = scalar_lea.vmem [#allocation7], %s1286_s29 }
 0x570   : > { %s1186_s16 = sshll.u32 %s361_s14, 4  ;;  %s2003_s16 = int_to_ptr.vmem [resolvable:$true] %s1186_s16 }
 0x571   : > { %s1586_s17 = scalar_lea.vmem %s2003_s16, 128  ;;  %p1593_p2 = scmp.lt.s32.totalorder %s2003_s16, %s1591_s21 }
 0x572   : > { %p1587_p9 = scmp.ne.s32.totalorder %s2003_s16, %s1586_s17  ;;  %p1594_p3 = scmp.lt.s32.totalorder %s1592_s24, %s1586_s17 }
 0x574   : > { %p1588_p12 = pnand %p1587_p9, %p1767_p5  ;;  %p1595_p4 = por %p1594_p3, %p1593_p2 }
 0x576   : > { %p1589_p1 = pneg %p1588_p12 }
 0x578   : > { %p1596_p7 = pnand %p1595_p4, %p1589_p1 }
 0x5b2   : > { %v918_v4 = vpop.permute.xlu1 %917 }
 0x5b3   : > { %v928_v7 = vsel %vm478_vm4, %v585_v5, %v918_v4 }
 0x5d8   : > { %v922_v6 = vpop.permute.xlu0 %921 }
 0x5d9   : > { %v930_v9 = vsel %vm929_vm6, %v928_v7, %v922_v6 }
 0x5e0   : > { %v926_v10 = vpop.permute.xlu1 %925 }
 0x5e1   : > { %v932_v11 = vsel %vm931_vm7, %v930_v9, %v926_v10 }
 0x5e2   : > { %v933_v12 = vpack.c.bf16 %v932_v11, %v932_v11 }
 0x5e4   : > { %1410 = vmatmul.mubr.msk.bf16.vlgmr.msra.gmra.mrb[16].mxu1 %vm375_vm0, %v933_v12 }
 0x5e5   : > { %1429 = vmatprep.mubr.msk.bf16.mxu1 %vm1663_vm1, %v1662_v8 }
 0x6b7   : > { %v991_v18 = vpop.f32.mrb[16].mxu1 }
 0x6b8   : > { %v992_v19 = vadd.f32 %v991_v18, %v941_v17  ;;  %v1411_v20 = vpop.f32.mrb[17].mxu1 }
 0x6b9   : > { %v994_v21 = vpop.f32.mrb[18].mxu1 }
 0x6ba   : > { %v1968_v22 = vadd.f32 %v992_v19, %v1854_v0  ;;  %v1412_v23 = vpop.f32.mrb[19].mxu1  ;;  %v1517_v0 = vld [vmem:[%s2051_s7] sm:$0xff]  }
 0x6bb   : > { %1422 = vmatpush3.bf16.msra.mxu1 %v1517_v0 }
 0x6bc   : > { %v1000_v24 = vsel %vm375_vm0, %v1968_v22, 0.0  ;;  %1423 = vmatprep.subr.bf16.mxu1 %v1662_v8 }
 0x6bd   : > { %1001 = vadd.xlane.f32.xlu1 %v1000_v24 }
 0x6bf   : > { %1424 = vmatpush3.bf16.msra.mxu1 %v1518_v32 }
 0x6c0   : > { %1425 = vmatprep.subr.bf16.mxu1 %v1662_v8 }
 0x6c3   : > { %1426 = vmatpush3.bf16.msra.mxu1 %v1519_v48 }
 0x6c4   : > { %1427 = vmatprep.subr.bf16.mxu1 %v1662_v8  ;;  %v1100_v8 = vsub.s32 2, %v1958_v14 }
 0x6c6   : > { %v1101_v59 = vrot.slane %v1964_v16, %v1100_v8 }
 0x6c7   : > { %1428 = vmatpush3.bf16.msra.mxu1 %v1520_v49 }
 0x74a   : > { %v1002_v25 = vpop.xlane.xlu1 %1001 }
 0x74b   : > { %v1003_v26 = vmul.f32 0.03125, %v1002_v25 }
 0x74d   : > { %v1004_v27 = vsub.f32 %v1968_v22, %v1003_v26 }
 0x74f   : > { %v1005_v28 = vmul.f32 %v1004_v27, %v1004_v27  ;;  %v1020_v42 = vmul.f32 %v1019_v41, %v1004_v27 }
 0x751   : > { %v1006_v29 = vsel %vm375_vm0, %v1005_v28, 0.0 }
 0x752   : > { %1007 = vadd.xlane.f32.xlu0 %v1006_v29 }
 0x7df   : > { %v1008_v33 = vpop.xlane.xlu0 %1007 }
 0x7e0   : > { %v1009_v34 = vmul.f32 0.032258064, %v1008_v33 }
 0x7e2   : > { %1541 = vrsqrt.f32 %v1009_v34  ;;  %vm1012_vm8 = vcmp.eq.f32.partialorder %v1009_v34, inf  ;;  %v1015_v37 = vand.u32 2147483648, %v1009_v34  ;;  %vm1014_vm9 = vcmp.eq.f32.partialorder %v1009_v34, 0.0 }
 0x7ec   : > { %v1542_v35 = vpop.eup %1541 }
 0x7ed   : > { %v1011_v36 = vmul.f32 %v1542_v35, %v1009_v34 }
 0x7ef   : > { %v1013_v38 = vsel %vm1012_vm8, %v1009_v34, %v1011_v36 }
 0x7f0   : > { %v1016_v39 = vsel %vm1014_vm9, %v1015_v37, %v1013_v38 }
 0x7f1   : > { %v1017_v40 = vadd.f32 1e-05, %v1016_v39 }
 0x7f3   : > { %1543 = vrcp.f32 %v1017_v40 }
 0x7fd   : > { %v1544_v43 = vpop.eup %1543 }
 0x7fe   : > { %v1021_v45 = vmul.f32 %v1544_v43, %v1020_v42 }
 0x800   : > { %v1023_v46 = vadd.f32 %v1022_v44, %v1021_v45 }
 0x802   : > { %v1024_v47 = vpack.c.bf16 %v1023_v46, %v1023_v46 }
 0x804   : > { %1418 = vmatmul.mubr.msk.bf16.vlgmr.msra.gmra.mrb[20].mxu0 %vm375_vm0, %v1024_v47 }
 0x8d7   : > { %v1082_v52 = vpop.f32.mrb[20].mxu0 }
 0x8d8   : > { %v1083_v53 = vadd.f32 %v1082_v52, %v1032_v51  ;;  %v1419_v54 = vpop.f32.mrb[21].mxu0 }
 0x8d9   : > { %v1085_v55 = vpop.f32.mrb[22].mxu0 }
 0x8da   : > { %v1088_v56 = vmax.f32 %v1083_v53, 0.0  ;;  %v1420_v57 = vpop.f32.mrb[23].mxu0 }
 0x8dc   : > { %v1089_v58 = vpack.c.bf16 %v1088_v56, %v1088_v56 }
 0x8de   : > { %1430 = vmatmul.mubr.msk.bf16.vlgmr.msra.gmra.mrb[20].mxu1 %vm1126_vm10, %v1089_v58 }
 0x9b1   : > { %v1164_v60 = vpop.f32.mrb[20].mxu1 }
 0x9b2   : > { %v1165_v61 = vadd.f32 %v1164_v60, %v1101_v59  ;;  %v1431_v62 = vpop.f32.mrb[21].mxu1 }
 0x9b3   : > { %v1167_v63 = vpop.f32.mrb[22].mxu1 }
 0x9b4   : > { %v1170_v1 = vadd.f32 %v1165_v61, %v1968_v22  ;;  %v1432_v2 = vpop.f32.mrb[23].mxu1 }
 0x9b6   : > { %1171 = vst.msk [vmem:[%s361_s14] sm:$0xff] %vm375_vm0, %v1170_v1 }
 0x9b7   : > { %1599 = shalt.err (!%p1596_p7)
}
 0x9b8   : > { %s1600_s25 = scalar_lea.hbm %s2001_s18, 128  ;;  %s1604_s29 = scalar_lea.hbm %s2053_s9, 256 }
 0x9b9   : > { %p1601_p8 = scmp.ne.s32.totalorder %s2001_s18, %s1600_s25  ;;  %p1605_p6 = scmp.lt.u32.totalorder %s2001_s18, %s2053_s9 }
 0x9ba   : > { %p1606_p10 = scmp.lt.u32.totalorder %s1604_s29, %s1600_s25  ;;  %p1608_p9 = scmp.lt.u32.totalorder %s1600_s25, %s2001_s18 }
 0x9bb   : > { %p1602_p0 = pnand %p1601_p8, %p1767_p5 }
 0x9bc   : > { %p1607_p13 = por %p1606_p10, %p1605_p6 }
 0x9bd   : > { %p1603_p11 = pneg %p1602_p0 }
 0x9be   : > { %p1609_p12 = por %p1608_p9, %p1607_p13 }
 0x9c0   : > { %p1610_p1 = pnand %p1609_p12, %p1603_p11 }
 0x9c2   : > { %1613 = shalt.err (!%p1610_p1)
}
 0x9c3   : > { %1441 = dma.vmem_to_hbm [thread:$0]  (%p1767_p5), %s2003_s16, 128, %s2001_s18, %s1173_s13  }
 0x9c4 PF: > { %p1458_p2 = scmp.ge.s32.totalorder %s1656_s12, 2  ;;  %s1198_s23 = sand.u32 1, %s1644_s30  }
 0x9c5   : > { %p2066_p3 = scmp.ne.s32.totalorder %s2059_s20, 0  ;;  %s1199_s11 = scalar_lea.sflag [#allocation4], %s1198_s23 }
 0x9c7   : > { %p1451_p4 = pnand %p1458_p2, %p2066_p3 }
 0x9c9   : > { %1639 = dma.done.wait (!%p1451_p4), %s1199_s11, 128  }
 0x9ca   : > { %1641 = vsyncadd (!%p1451_p4), %s1199_s11, 4294967168  ;;  %s2067_s17 = sld [smem:[#allocation11_spill]]  ;;  %s2068_s11 = sld [smem:[#allocation12_spill]] }
 0x9cb   : > { %p21_p7 = scmp.ge.s32.totalorder %s1754_s15, 4   ;;  %s2069_s30 = smov %s1648_s10 }
 0x9cc   : > { %s2071_s12 = smov %s1754_s15 }
 0x9cd   :  { %23 = sbr.rel (!%p21_p7) target bundleno = 5 (0x5), region = 104 }
 0x9d0   : > { %s2070_s10 = smov %s2067_s17 }
 0x9d4   :  { %1204 = vsyncpa [#allocation3], 1 }
 0x9d5   :  { %1206 = vsyncpa [#allocation3 + $0x1], 1 }
 0x9d6   :  { %1207 = vsyncpa [#allocation4], 1 }
 0x9d7   :  { %1209 = vsyncpa [#allocation4 + $0x1], 1 }
 0x9d8   :  { %1210 = vsyncpa [#allocation5], 1 }
 0x9d9   :  { %1212 = vsyncpa [#allocation5 + $0x1], 1 }

// kernel: tpu_custom_call.1
= control target key start
LH: loop header
LB: loop body
LE: loop exit
PB: predicated region body
PF: predicated region fallthrough
CT: control target
= control target key end

     0   :  { %14 = vsyncpa [#allocation5], 0  ;;  %s2044_s0 = inlined_call_operand.hbm [shape: f32[4], index: 0, kind: input, shape index: {}]   ;;  %s2045_s1 = inlined_call_operand.vmem [shape: f32[2,8,32], index: 1, kind: input, shape index: {}]   ;;  %s2046_s2 = inlined_call_operand.vmem [shape: f32[2,1,8], index: 2, kind: input, shape index: {}]   ;;  %s2047_s3 = inlined_call_operand.vmem [shape: bf16[32,96], index: 3, kind: input, shape index: {}]   ;;  %s2048_s4 = inlined_call_operand.vmem [shape: f32[1,96], index: 4, kind: input, shape index: {}]   ;;  %s2049_s5 = inlined_call_operand.vmem [shape: bf16[32,32], index: 5, kind: input, shape index: {}]   ;;  %s2050_s6 = inlined_call_operand.hbm [shape: bf16[32,64], index: 6, kind: input, shape index: {}]   ;;  %s2051_s7 = inlined_call_operand.vmem [shape: bf16[64,32], index: 7, kind: input, shape index: {}]   ;;  %s2052_s8 = inlined_call_operand.vmem [shape: f32[3,64], index: 8, kind: input, shape index: {}]   ;;  %s2053_s9 = inlined_call_operand.hbm [shape: f32[2,8,32], index: 9, kind: output, shape index: {}]  }
   0x1   :  { %15 = vsyncpa [#allocation3], 0 }
   0x2   :  { %16 = vsyncpa [#allocation4], 0 }
   0x3   :  { %18 = vsyncpa [#allocation4 + $0x1], 0  ;;  %s1729_s30 = smov 0   ;;  %s1731_s10 = smov 0  }
   0x4   :  { %s1733_s11 = smov 0   ;;  %s1735_s12 = smov 0  }
   0x5 LB: > { %2056 = sst [smem:[#allocation11_spill]] %s1652_s11  ;;  %s1750_s13 = sadd.s32 4294967295, %s1656_s12   ;;  %s1656_s12 = sphi %s1735_s12, %s2071_s12   ;;  %s1652_s11 = sphi %s1733_s11, %s2068_s11   ;;  %s1648_s10 = sphi %s1731_s10, %s2070_s10   ;;  %s1644_s30 = sphi %s1729_s30, %s2069_s30  }
   0x6   : > { %s1278_s14 = sadd.s32 4294967294, %s1656_s12   ;;  %s1754_s15 = sadd.s32 1, %s1656_s12  }
   0x7   : > { %s230_s16 = sadd.s32 1, %s1652_s11  ;;  %s227_s17 = ssub.s32 %s1656_s12, %s1754_s15 }
   0x8   : > { %p240_p0 = scmp.ne.s32.totalorder %s1652_s11, %s1648_s10  ;;  %p228_p1 = scmp.eq.s32.totalorder %s227_s17, 0 }
   0x9   : > { %p241_p2 = scmp.eq.s32.totalorder %s1750_s13, 1  ;;  %p246_p3 = scmp.ne.s32.totalorder %s1648_s10, %s1644_s30 }
   0xa   : > { %p247_p4 = scmp.eq.s32.totalorder %s1278_s14, 1  ;;  %p1279_p7 = scmp.ge.s32.totalorder %s1656_s12, 1 }
   0xb   : > { %s1765_s18 = scalar_select %p228_p1, %s1652_s11, %s230_s16  }
   0xc   : > { %p1767_p5 = por %p241_p2, %p240_p0  ;;  %p1771_p6 = por %p247_p4, %p246_p3 }
   0xd   : > { %2057 = sst [smem:[#allocation12_spill]] %s1765_s18  ;;  %p254_p8 = scmp.lt.s32.totalorder %s1656_s12, 3 }
   0xe   : > { %s2059_s20 = scalar_select %p1771_p6, 1, 0 }
   0xf   : > { %p1777_p9 = pnand %p1279_p7, %p254_p8  ;;  %p2055_p10 = scmp.eq.s32.totalorder %s1750_s13, 0 }
  0x10   : > { %s1658_s22 = smov [#allocation6]   ;;  %s1545_s27 = scalar_lea.hbm %s2044_s0, 16 }
  0x11   : > { %p1443_p11 = pneg %p1777_p9  ;;  %s284_s23 = sshll.u32 %s1658_s22, 4  ;;  %s1790_s23 = int_to_ptr.vmem [resolvable:$true] %s284_s23 }
  0x12   : > { %p1546_p13 = scmp.ne.s32.totalorder %s2044_s0, %s1545_s27  ;;  %p1552_p3 = scmp.lt.u32.totalorder %s1545_s27, %s2044_s0 }
  0x13   : > { %p1786_p12 = pnand %p2055_p10, %p1443_p11 }
  0x15   : > { %p1547_p0 = pneg %p1786_p12 }
  0x17   : > { %p1548_p1 = pnand %p1547_p0, %p1546_p13 }
  0x19   : > { %p1549_p2 = pneg %p1548_p1 }
  0x1b   : > { %p1554_p4 = pnand %p1552_p3, %p1549_p2 }
  0x1d   : > { %1557 = shalt.err (!%p1554_p4)
}
  0x1e   : > { %s1659_s17 = smov [#allocation2]   ;;  %s1558_s29 = scalar_lea.hbm %s2050_s6, 256 }
  0x1f   : > { %1446 = dma.hbm_to_smem (!%p1786_p12), %s2044_s0, 16, %s1659_s17, [#allocation5]  }
  0x20   : > { %p1559_p7 = scmp.ne.s32.totalorder %s2050_s6, %s1558_s29  ;;  %p1565_p13 = scmp.lt.u32.totalorder %s1558_s29, %s2050_s6 }
  0x22   : > { %p1561_p8 = pnand %p1559_p7, %p1547_p0 }
  0x24   : > { %p1562_p11 = pneg %p1561_p8 }
  0x26   : > { %p1567_p1 = pnand %p1565_p13, %p1562_p11 }
  0x28   : > { %1570 = shalt.err (!%p1567_p1)
}
  0x29   : > { %s1571_s16 = scalar_lea.vmem %s1790_s23, 256  ;;  %p1579_p10 = scmp.lt.s32.totalorder %s1790_s23, %s1790_s23 }
  0x2a   : > { %p1572_p2 = scmp.ne.s32.totalorder %s1790_s23, %s1571_s16  ;;  %p1580_p7 = scmp.lt.s32.totalorder %s1571_s16, %s1571_s16 }
  0x2c   : > { %p1574_p3 = pnand %p1572_p2, %p1547_p0  ;;  %p1581_p8 = por %p1580_p7, %p1579_p10 }
  0x2e   : > { %p1575_p4 = pneg %p1574_p3 }
  0x30   : > { %p1582_p6 = pnand %p1581_p8, %p1575_p4 }
  0x32   : > { %1585 = shalt.err (!%p1582_p6)
}
  0x33   : > { %s1660_s11 = smov 64   ;;  %s1661_s18 = smov 4  }
  0x34   : > { %1449 = dma.hbm_to_vmem [thread:$0]  (!%p1786_p12), %s2050_s6, 256, %s1790_s23, [#allocation3], %s1660_s11, %s1660_s11, %s1661_s18  }
  0x35   : > { %319 = sbr.rel (%p1777_p9) target bundleno = 2500 (0x9c4), region = 56  ;;  %p2062_p0 = scmp.eq.s32.totalorder (!%p1777_p9), %s1750_s13, 0 }
  0x3c   : > { %1631 = dma.done.wait (%p2062_p0), [#allocation5], 16   ;;  %p2063_p11 = pmov %p2062_p0 }
  0x3d   : > { %p2064_p6 = pmov %p2062_p0 }
  0x3e   : > { %1633 = vsyncadd (%p2063_p11), [#allocation5], 4294967280 }
  0x3f   : > { %1635 = dma.done.wait (%p2064_p6), [#allocation3], 256   ;;  %p2065_p10 = pmov %p2062_p0 }
  0x41   : > { %1637 = vsyncadd (%p2065_p10), [#allocation3], 4294967040 }
  0x42   : > { %329 = sfence }
  0x43   : > { %p362_p13 = scmp.lt.s32.totalorder %s1750_s13, 1  ;;  %vm375_vm0 = vcmask 261120   ;;  %v1511_v7 = vld [vmem:[%s2047_s3] sm:$0xff]   ;;  %v1662_v8 = vmov 0.0   ;;  %vm1663_vm1 = vmmov 0   ;;  %v1512_v9 = vld [vmem:[%s2047_s3 + $0x8] sm:$0xff]  }
  0x44   : > { %1349 = vmatprep.subr.bf16.mxu0 %v1662_v8  ;;  %1353 = vmatprep.mubr.msk.bf16.mxu0 %vm1663_vm1, %v1662_v8  ;;  %s373_s16 = sld [smem:[#allocation2]]  ;;  %s1288_s11 = sld [smem:[#allocation2 + $0x1]]  ;;  %v1289_v25 = vld [vmem:[%s2048_s4] ss:$0 sm:$0xff]  ;;  %vm478_vm4 = vcmask 64512   ;;  %vm540_vm5 = vcmask 1043456  }
  0x45   : > { %s1848_s23 = scalar_select %p362_p13, %s1750_s13, 1  ;;  %1350 = vmatpush3.bf16.msra.mxu0 %v1511_v7  ;;  %1357 = vmatprep.subr.bf16.mxu1 %v1662_v8  ;;  %vm929_vm6 = vcmask 130048   ;;  %vm931_vm7 = vcmask 195584   ;;  %vm1126_vm10 = vcmask 523264  }
  0x46   : > { %1351 = vmatprep.subr.bf16.mxu0 %v1662_v8  ;;  %1359 = vmatprep.mubr.msk.bf16.mxu1 %vm1663_vm1, %v1662_v8  ;;  %s1664_s22 = smov 120   ;;  %s1666_s24 = smov 88  }
  0x47   : > { %s1287_s21 = sshll.u32 %s1848_s23, 3  ;;  %s1667_s25 = smov 80  }
  0x48   : > { %s365_s26 = scalar_lea.vmem %s2045_s1, %s1287_s21  ;;  %s1665_s21 = smov 96  }
  0x49   : > { %v1854_v0 = vld [vmem:[%s365_s26] sm:$0xff]  ;;  %1352 = vmatpush3.bf16.msra.mxu0 %v1512_v9  ;;  %s1668_s26 = smov 112   ;;  %s1669_s28 = smov 72  }
  0x4a   : > { %v376_v1 = vsel %vm375_vm0, %v1854_v0, 0.0  ;;  %1363 = vmatprep.subr.bf16.mxu0 %v1662_v8  ;;  %v396_v18 = vstv %s373_s16  ;;  %v399_v21 = vstv %s1288_s11  ;;  %s1670_s29 = smov 104   ;;  %s368_s16 = scalar_lea.vmem %s2046_s2, %s1848_s23 }
  0x4b   : > { %377 = vadd.xlane.f32.xlu0 %v376_v1  ;;  %v1293_v43 = vld [vmem:[%s368_s16] ss:$0 sm:$0xff]  ;;  %s1671_s23 = smov 64   ;;  %s1672_s11 = smov 56  }
  0x4c   : > { %s1673_s18 = smov 48   ;;  %s1674_s17 = smov 40  }
  0x4d   : > { %s1316_s27 = sshll.u32 %s1750_s13, 7 }
  0xd8   : > { %v378_v2 = vpop.xlane.xlu0 %377 }
  0xd9   : > { %v380_v3 = vmul.f32 0.03125, %v378_v2 }
  0xdb   : > { %v381_v4 = vsub.f32 %v1854_v0, %v380_v3 }
  0xdd   : > { %v382_v5 = vmul.f32 %v381_v4, %v381_v4  ;;  %v397_v19 = vmul.f32 %v396_v18, %v381_v4 }
  0xdf   : > { %v383_v6 = vsel %vm375_vm0, %v382_v5, 0.0 }
  0xe0   : > { %384 = vadd.xlane.f32.xlu0 %v383_v6 }
 0x16d   : > { %v385_v10 = vpop.xlane.xlu0 %384 }
 0x16e   : > { %v386_v11 = vmul.f32 0.032258064, %v385_v10 }
 0x170   : > { %1521 = vrsqrt.f32 %v386_v11  ;;  %vm389_vm2 = vcmp.eq.f32.partialorder %v386_v11, inf  ;;  %v392_v14 = vand.u32 2147483648, %v386_v11  ;;  %vm391_vm3 = vcmp.eq.f32.partialorder %v386_v11, 0.0 }
 0x17a   : > { %v1522_v12 = vpop.eup %1521 }
 0x17b   : > { %v388_v13 = vmul.f32 %v1522_v12, %v386_v11 }
 0x17d   : > { %v390_v15 = vsel %vm389_vm2, %v386_v11, %v388_v13 }
 0x17e   : > { %v393_v16 = vsel %vm391_vm3, %v392_v14, %v390_v15 }
 0x17f   : > { %v394_v17 = vadd.f32 1e-05, %v393_v16 }
 0x181   : > { %1523 = vrcp.f32 %v394_v17 }
 0x18b   : > { %v1524_v20 = vpop.eup %1523 }
 0x18c   : > { %v398_v22 = vmul.f32 %v1524_v20, %v397_v19 }
 0x18e   : > { %v400_v23 = vadd.f32 %v399_v21, %v398_v22 }
 0x190   : > { %v401_v24 = vpack.c.bf16 %v400_v23, %v400_v23 }
 0x192   : > { %1354 = vmatmul.mubr.msk.bf16.vlgmr.msra.gmra.mrb[0].mxu0 %vm375_vm0, %v401_v24 }
 0x193   : > { %1365 = vmatprep.mubr.msk.bf16.mxu0 %vm1663_vm1, %v1662_v8 }
 0x265   : > { %v462_v26 = vpop.f32.mrb[0].mxu0 }
 0x266   : > { %v463_v27 = vadd.f32 %v1289_v25, %v462_v26  ;;  %v1355_v28 = vpop.f32.mrb[1].mxu0 }
 0x267   : > { %v465_v29 = vpop.f32.mrb[2].mxu0 }
 0x268   : > { %v1880_v30 = vpack.c.bf16 %v463_v27, %v463_v27  ;;  %v1356_v31 = vpop.f32.mrb[3].mxu0 }
 0x26a   : > { %586 = vrot.lane.b32.xlu0 %v1880_v30, %s1664_s22  ;;  %476 = vrot.lane.b32.xlu1 %v1880_v30, %s1665_s21  ;;  %s1675_s22 = smov 8  }
 0x26e   : > { %588 = vrot.lane.b32.xlu1 %v1880_v30, %s1666_s24 }
 0x272   : > { %698 = vrot.lane.b32.xlu1 %v1880_v30, %s1667_s25 }
 0x276   : > { %696 = vrot.lane.b32.xlu1 %v1880_v30, %s1668_s26 }
 0x27a   : > { %808 = vrot.lane.b32.xlu1 %v1880_v30, %s1669_s28  ;;  %s1676_s28 = smov 16  }
 0x27e   : > { %806 = vrot.lane.b32.xlu1 %v1880_v30, %s1670_s29  ;;  %s1677_s29 = smov 24  }
 0x2dc   : > { %v477_v32 = vpop.permute.xlu1 %476  ;;  %v587_v37 = vpop.permute.xlu0 %586 }
 0x2dd   : > { %v483_v33 = vsel %vm478_vm4, %v477_v32, 0 }
 0x2de   : > { %1358 = vmatpush3.bf16.xpose.msra.mxu1 %v483_v33 }
 0x2df   : > { %1369 = vmatprep.subr.bf16.mxu1 %v1662_v8 }
 0x2e0   : > { %v589_v34 = vpop.permute.xlu1 %588 }
 0x2e1   : > { %v594_v35 = vsel %vm478_vm4, %v589_v34, 0 }
 0x2e4   : > { %v699_v36 = vpop.permute.xlu1 %698 }
 0x2e5   : > { %1360 = vmatmul.mubr.msk.bf16.vlgmr.msra.gmra.mrb[0].mxu1 %vm478_vm4, %v1880_v30  ;;  %v704_v39 = vsel %vm478_vm4, %v699_v36, 0 }
 0x2e6   : > { %1370 = vmatpush3.bf16.xpose.msra.mxu1 %v594_v35  ;;  %1371 = vmatprep.mubr.msk.bf16.mxu1 %vm1663_vm1, %v1662_v8 }
 0x2e7   : > { %1381 = vmatprep.subr.bf16.mxu1 %v1662_v8 }
 0x2e8   : > { %v697_v38 = vpop.permute.xlu1 %696 }
 0x2ec   : > { %v809_v40 = vpop.permute.xlu1 %808 }
 0x2ed   : > { %1372 = vmatmul.mubr.msk.bf16.vlgmr.msra.gmra.mrb[4].mxu1 %vm478_vm4, %v587_v37  ;;  %v814_v41 = vsel %vm478_vm4, %v809_v40, 0 }
 0x2ee   : > { %1382 = vmatpush3.bf16.xpose.msra.mxu1 %v704_v39  ;;  %1383 = vmatprep.mubr.msk.bf16.mxu1 %vm1663_vm1, %v1662_v8 }
 0x2ef   : > { %1393 = vmatprep.subr.bf16.mxu1 %v1662_v8 }
 0x2f0   : > { %v807_v42 = vpop.permute.xlu1 %806 }
 0x2f5   : > { %1384 = vmatmul.mubr.msk.bf16.vlgmr.msra.gmra.mrb[8].mxu1 %vm478_vm4, %v697_v38 }
 0x2f6   : > { %1394 = vmatpush3.bf16.xpose.msra.mxu1 %v814_v41  ;;  %1395 = vmatprep.mubr.msk.bf16.mxu1 %vm1663_vm1, %v1662_v8 }
 0x2f7   : > { %1405 = vmatprep.subr.bf16.mxu1 %v1662_v8 }
 0x2fd   : > { %1396 = vmatmul.mubr.msk.bf16.vlgmr.msra.gmra.mrb[12].mxu1 %vm478_vm4, %v807_v42 }
 0x2fe   : > { %1409 = vmatprep.mubr.msk.bf16.mxu1 %vm1663_vm1, %v1662_v8 }
 0x3b8   : > { %v519_v44 = vpop.f32.mrb[0].mxu1 }
 0x3b9   : > { %v520_v45 = vadd.f32 %v1293_v43, %v519_v44  ;;  %v1361_v46 = vpop.f32.mrb[1].mxu1 }
 0x3ba   : > { %v522_v47 = vpop.f32.mrb[2].mxu1 }
 0x3bb   : > { %v1362_v48 = vpop.f32.mrb[3].mxu1  ;;  %v525_v49 = vsel %vm478_vm4, %v520_v45, -inf }
 0x3bc   : > { %526 = vmax.xlane.f32.xlu1 %v525_v49 }
 0x3c0   : > { %v630_v50 = vpop.f32.mrb[4].mxu1 }
 0x3c1   : > { %v631_v51 = vadd.f32 %v1293_v43, %v630_v50  ;;  %v1373_v52 = vpop.f32.mrb[5].mxu1  ;;  %v1513_v50 = vld [vmem:[%s2049_s5] sm:$0xff]  }
 0x3c2   : > { %v633_v53 = vpop.f32.mrb[6].mxu1  ;;  %1406 = vmatpush3.bf16.msra.mxu1 %v1513_v50 }
 0x3c3   : > { %v1374_v54 = vpop.f32.mrb[7].mxu1  ;;  %v636_v55 = vsel %vm478_vm4, %v631_v51, -inf  ;;  %1407 = vmatprep.subr.bf16.mxu1 %v1662_v8 }
 0x3c4   : > { %637 = vmax.xlane.f32.xlu0 %v636_v55 }
 0x3c8   : > { %v740_v56 = vpop.f32.mrb[8].mxu1 }
 0x3c9   : > { %v1385_v57 = vpop.f32.mrb[9].mxu1  ;;  %v741_v3 = vadd.f32 %v1293_v43, %v740_v56 }
 0x3ca   : > { %v743_v58 = vpop.f32.mrb[10].mxu1 }
 0x3cb   : > { %v1386_v59 = vpop.f32.mrb[11].mxu1  ;;  %v746_v4 = vsel %vm478_vm4, %v741_v3, -inf }
 0x3cd   : > { %535 = vrot.lane.b32.xlu1 %v1880_v30, %s1671_s23 }
 0x3d0   : > { %v850_v60 = vpop.f32.mrb[12].mxu1 }
 0x3d1   : > { %v851_v61 = vadd.f32 %v1293_v43, %v850_v60  ;;  %v1397_v62 = vpop.f32.mrb[13].mxu1 }
 0x3d2   : > { %v853_v63 = vpop.f32.mrb[14].mxu1 }
 0x3d3   : > { %v1398_v1 = vpop.f32.mrb[15].mxu1  ;;  %v856_v2 = vsel %vm478_vm4, %v851_v61, -inf }
 0x3d4   : > { %857 = vmax.xlane.f32.xlu0 %v856_v2 }
 0x3ea   : > { %646 = vrot.lane.b32.xlu0 %v1880_v30, %s1672_s11 }
 0x3f1   : > { %747 = vmax.xlane.f32.xlu1 %v746_v4 }
 0x402   : > { %756 = vrot.lane.b32.xlu1 %v1880_v30, %s1673_s18  ;;  %s2001_s18 = scalar_lea.hbm %s2053_s9, %s1316_s27 }
 0x406   : > { %866 = vrot.lane.b32.xlu1 %v1880_v30, %s1674_s17  ;;  %s1305_s17 = sld [smem:[#allocation2 + $0x2]] }
 0x449   : > { %v527_v5 = vpop.xlane.xlu1 %526 }
 0x44a   : > { %v528_v6 = vsub.f32 %v520_v45, %v527_v5 }
 0x44c   : > { %v529_v7 = vmul.f32 1.442695, %v528_v6 }
 0x44d   : > { %v536_v9 = vpop.permute.xlu1 %535 }
 0x44e   : > { %1525 = vpow2.f32 %v529_v7  ;;  %v542_v10 = vsel %vm540_vm5, %v536_v9, 0 }
 0x44f   : > { %1364 = vmatpush3.bf16.msra.mxu0 %v542_v10 }
 0x450   : > { %1375 = vmatprep.subr.bf16.mxu0 %v1662_v8 }
 0x451   : > { %v638_v11 = vpop.xlane.xlu0 %637 }
 0x452   : > { %v639_v12 = vsub.f32 %v631_v51, %v638_v11  ;;  %v1514_v51 = vld [vmem:[%s2049_s5 + $0x8] sm:$0xff]  }
 0x453   : > { %1408 = vmatpush3.bf16.msra.mxu1 %v1514_v51 }
 0x454   : > { %v640_v13 = vmul.f32 1.442695, %v639_v12  ;;  %1421 = vmatprep.subr.bf16.mxu1 %v1662_v8 }
 0x456   : > { %1527 = vpow2.f32 %v640_v13  ;;  %v938_v13 = vlaneseq }
 0x458   : > { %v1526_v14 = vpop.eup %1525 }
 0x459   : > { %v534_v15 = vpack.c.bf16 %v1526_v14, %v1526_v14  ;;  %v531_v26 = vsel %vm478_vm4, %v1526_v14, 0.0  ;;  %v1958_v14 = vshrl.u32 %v938_v13, 7 }
 0x45b   : > { %1366 = vmatmul.mubr.msk.bf16.vlgmr.msra.gmra.mrb[4].mxu0 %vm478_vm4, %v534_v15  ;;  %v940_v15 = vsub.s32 0, %v1958_v14  ;;  %v1031_v50 = vsub.s32 1, %v1958_v14 }
 0x45c   : > { %1377 = vmatprep.mubr.msk.bf16.mxu0 %vm1663_vm1, %v1662_v8 }
 0x460   : > { %v1528_v16 = vpop.eup %1527 }
 0x461   : > { %v858_v17 = vpop.xlane.xlu0 %857  ;;  %v642_v18 = vsel %vm478_vm4, %v1528_v16, 0.0  ;;  %v645_v23 = vpack.c.bf16 %v1528_v16, %v1528_v16  ;;  %v1964_v16 = vld [vmem:[%s2052_s8] sm:$0x7] }
 0x462   : > { %v859_v19 = vsub.f32 %v851_v61, %v858_v17  ;;  %643 = vadd.xlane.f32.xlu0 %v642_v18  ;;  %v941_v17 = vrot.slane %v1964_v16, %v940_v15  ;;  %v1032_v51 = vrot.slane %v1964_v16, %v1031_v50 }
 0x464   : > { %v860_v20 = vmul.f32 1.442695, %v859_v19 }
 0x465   : > { %v647_v21 = vpop.permute.xlu0 %646 }
 0x466   : > { %1529 = vpow2.f32 %v860_v20  ;;  %v652_v22 = vsel %vm540_vm5, %v647_v21, 0 }
 0x467   : > { %1376 = vmatpush3.bf16.msra.mxu0 %v652_v22 }
 0x468   : > { %1387 = vmatprep.subr.bf16.mxu0 %v1662_v8 }
 0x46a   : > { %1378 = vmatmul.mubr.msk.bf16.vlgmr.msra.gmra.mrb[8].mxu0 %vm478_vm4, %v645_v23 }
 0x46b   : > { %1389 = vmatprep.mubr.msk.bf16.mxu0 %vm1663_vm1, %v1662_v8 }
 0x470   : > { %v1530_v24 = vpop.eup %1529 }
 0x471   : > { %v862_v25 = vsel %vm478_vm4, %v1530_v24, 0.0  ;;  %v865_v37 = vpack.c.bf16 %v1530_v24, %v1530_v24 }
 0x472   : > { %863 = vadd.xlane.f32.xlu0 %v862_v25 }
 0x476   : > { %532 = vadd.xlane.f32.xlu0 %v531_v26 }
 0x47e   : > { %v748_v27 = vpop.xlane.xlu1 %747 }
 0x47f   : > { %v749_v28 = vsub.f32 %v741_v3, %v748_v27 }
 0x481   : > { %v750_v29 = vmul.f32 1.442695, %v749_v28 }
 0x482   : > { %v757_v30 = vpop.permute.xlu1 %756 }
 0x483   : > { %1531 = vpow2.f32 %v750_v29  ;;  %v762_v31 = vsel %vm540_vm5, %v757_v30, 0  ;;  %v1515_v30 = vld [vmem:[#allocation6] sm:$0xff]  }
 0x484   : > { %1388 = vmatpush3.bf16.msra.mxu0 %v762_v31  ;;  %v1516_v31 = vld [vmem:[#allocation6 + $0x8] sm:$0xff]  }
 0x485   : > { %1399 = vmatprep.subr.bf16.mxu0 %v1662_v8 }
 0x486   : > { %v867_v33 = vpop.permute.xlu1 %866 }
 0x487   : > { %v872_v36 = vsel %vm540_vm5, %v867_v33, 0 }
 0x48d   : > { %v1532_v32 = vpop.eup %1531 }
 0x48e   : > { %v752_v34 = vsel %vm478_vm4, %v1532_v32, 0.0  ;;  %v755_v35 = vpack.c.bf16 %v1532_v32, %v1532_v32  ;;  %v1518_v32 = vld [vmem:[%s2051_s7 + $0x8] sm:$0xff]  }
 0x48f   : > { %753 = vadd.xlane.f32.xlu1 %v752_v34 }
 0x490   : > { %1390 = vmatmul.mubr.msk.bf16.vlgmr.msra.gmra.mrb[12].mxu0 %vm478_vm4, %v755_v35 }
 0x491   : > { %1400 = vmatpush3.bf16.msra.mxu0 %v872_v36  ;;  %1401 = vmatprep.mubr.msk.bf16.mxu0 %vm1663_vm1, %v1662_v8 }
 0x492   : > { %1413 = vmatprep.subr.bf16.mxu0 %v1662_v8 }
 0x498   : > { %1402 = vmatmul.mubr.msk.bf16.vlgmr.msra.gmra.mrb[16].mxu0 %vm478_vm4, %v865_v37 }
 0x499   : > { %1417 = vmatprep.mubr.msk.bf16.mxu0 %vm1663_vm1, %v1662_v8  ;;  %1414 = vmatpush3.bf16.msra.mxu0 %v1515_v30 }
 0x49a   : > { %1415 = vmatprep.subr.bf16.mxu0 %v1662_v8 }
 0x49d   : > { %1416 = vmatpush3.bf16.msra.mxu0 %v1516_v31 }
 0x4ef   : > { %v644_v40 = vpop.xlane.xlu0 %643 }
 0x4f0   : > { %1533 = vrcp.f32 %v644_v40 }
 0x4fa   : > { %v1534_v43 = vpop.eup %1533 }
 0x4ff   : > { %v864_v52 = vpop.xlane.xlu0 %863 }
 0x503   : > { %v533_v2 = vpop.xlane.xlu0 %532 }
 0x51c   : > { %v754_v49 = vpop.xlane.xlu1 %753 }
 0x51d   : > { %1535 = vrcp.f32 %v754_v49  ;;  %v1520_v49 = vld [vmem:[%s2051_s7 + $0x18] sm:$0xff]  }
 0x51e   : > { %1537 = vrcp.f32 %v864_v52 }
 0x51f   : > { %1539 = vrcp.f32 %v533_v2 }
 0x527   : > { %v1536_v53 = vpop.eup %1535 }
 0x528   : > { %v1538_v59 = vpop.eup %1537 }
 0x529   : > { %v1540_v3 = vpop.eup %1539 }
 0x52e   : > { %v578_v38 = vpop.f32.mrb[4].mxu0 }
 0x52f   : > { %v1367_v39 = vpop.f32.mrb[5].mxu0  ;;  %v585_v5 = vmul.f32 %v1540_v3, %v578_v38 }
 0x530   : > { %v581_v41 = vpop.f32.mrb[6].mxu0 }
 0x531   : > { %v1368_v42 = vpop.f32.mrb[7].mxu0  ;;  %v1019_v41 = vstv %s1305_s17 }
 0x53d   : > { %v688_v44 = vpop.f32.mrb[8].mxu0 }
 0x53e   : > { %v695_v45 = vmul.f32 %v1534_v43, %v688_v44  ;;  %v1379_v46 = vpop.f32.mrb[9].mxu0 }
 0x53f   : > { %v691_v47 = vpop.f32.mrb[10].mxu0 }
 0x540   : > { %917 = vrot.lane.b32.xlu1 %v695_v45, %s1675_s22  ;;  %v1380_v48 = vpop.f32.mrb[11].mxu0  ;;  %s1306_s22 = sld [smem:[#allocation2 + $0x3]] }
 0x541   : > { %v1519_v48 = vld [vmem:[%s2051_s7 + $0x10] sm:$0xff]  }
 0x546   : > { %v1022_v44 = vstv %s1306_s22  ;;  %s1678_s22 = smov [#allocation7]  }
 0x547   : > { %s1590_s21 = sshll.u32 %s1678_s22, 4  ;;  %s1591_s21 = int_to_ptr.vmem [resolvable:$false] %s1590_s21 }
 0x548   : > { %s1592_s24 = scalar_lea.vmem %s1591_s21, 256 }
 0x563   : > { %v798_v54 = vpop.f32.mrb[12].mxu0 }
 0x564   : > { %v805_v55 = vmul.f32 %v1536_v53, %v798_v54  ;;  %v1391_v56 = vpop.f32.mrb[13].mxu0 }
 0x565   : > { %v801_v57 = vpop.f32.mrb[14].mxu0 }
 0x566   : > { %921 = vrot.lane.b32.xlu0 %v805_v55, %s1676_s28  ;;  %v1392_v58 = vpop.f32.mrb[15].mxu0  ;;  %s359_s28 = sand.u32 1, %s1648_s10  }
 0x567   : > { %s1173_s13 = scalar_lea.sflag [#allocation4], %s359_s28 }
 0x56b   : > { %v908_v60 = vpop.f32.mrb[16].mxu0 }
 0x56c   : > { %v915_v61 = vmul.f32 %v1538_v59, %v908_v60  ;;  %v1403_v62 = vpop.f32.mrb[17].mxu0 }
 0x56d   : > { %v911_v63 = vpop.f32.mrb[18].mxu0 }
 0x56e   : > { %925 = vrot.lane.b32.xlu1 %v915_v61, %s1677_s29  ;;  %v1404_v1 = vpop.f32.mrb[19].mxu0  ;;  %s1286_s29 = sshll.u32 %s359_s28, 3 }
 0x56f   : > { %s361_s14 = scalar_lea.vmem [#allocation7], %s1286_s29 }
 0x570   : > { %s1186_s16 = sshll.u32 %s361_s14, 4  ;;  %s2003_s16 = int_to_ptr.vmem [resolvable:$true] %s1186_s16 }
 0x571   : > { %s1586_s17 = scalar_lea.vmem %s2003_s16, 128  ;;  %p1593_p2 = scmp.lt.s32.totalorder %s2003_s16, %s1591_s21 }
 0x572   : > { %p1587_p9 = scmp.ne.s32.totalorder %s2003_s16, %s1586_s17  ;;  %p1594_p3 = scmp.lt.s32.totalorder %s1592_s24, %s1586_s17 }
 0x574   : > { %p1588_p12 = pnand %p1587_p9, %p1767_p5  ;;  %p1595_p4 = por %p1594_p3, %p1593_p2 }
 0x576   : > { %p1589_p1 = pneg %p1588_p12 }
 0x578   : > { %p1596_p7 = pnand %p1595_p4, %p1589_p1 }
 0x5b2   : > { %v918_v4 = vpop.permute.xlu1 %917 }
 0x5b3   : > { %v928_v7 = vsel %vm478_vm4, %v585_v5, %v918_v4 }
 0x5d8   : > { %v922_v6 = vpop.permute.xlu0 %921 }
 0x5d9   : > { %v930_v9 = vsel %vm929_vm6, %v928_v7, %v922_v6 }
 0x5e0   : > { %v926_v10 = vpop.permute.xlu1 %925 }
 0x5e1   : > { %v932_v11 = vsel %vm931_vm7, %v930_v9, %v926_v10 }
 0x5e2   : > { %v933_v12 = vpack.c.bf16 %v932_v11, %v932_v11 }
 0x5e4   : > { %1410 = vmatmul.mubr.msk.bf16.vlgmr.msra.gmra.mrb[16].mxu1 %vm375_vm0, %v933_v12 }
 0x5e5   : > { %1429 = vmatprep.mubr.msk.bf16.mxu1 %vm1663_vm1, %v1662_v8 }
 0x6b7   : > { %v991_v18 = vpop.f32.mrb[16].mxu1 }
 0x6b8   : > { %v992_v19 = vadd.f32 %v991_v18, %v941_v17  ;;  %v1411_v20 = vpop.f32.mrb[17].mxu1 }
 0x6b9   : > { %v994_v21 = vpop.f32.mrb[18].mxu1 }
 0x6ba   : > { %v1968_v22 = vadd.f32 %v992_v19, %v1854_v0  ;;  %v1412_v23 = vpop.f32.mrb[19].mxu1  ;;  %v1517_v0 = vld [vmem:[%s2051_s7] sm:$0xff]  }
 0x6bb   : > { %1422 = vmatpush3.bf16.msra.mxu1 %v1517_v0 }
 0x6bc   : > { %v1000_v24 = vsel %vm375_vm0, %v1968_v22, 0.0  ;;  %1423 = vmatprep.subr.bf16.mxu1 %v1662_v8 }
 0x6bd   : > { %1001 = vadd.xlane.f32.xlu1 %v1000_v24 }
 0x6bf   : > { %1424 = vmatpush3.bf16.msra.mxu1 %v1518_v32 }
 0x6c0   : > { %1425 = vmatprep.subr.bf16.mxu1 %v1662_v8 }
 0x6c3   : > { %1426 = vmatpush3.bf16.msra.mxu1 %v1519_v48 }
 0x6c4   : > { %1427 = vmatprep.subr.bf16.mxu1 %v1662_v8  ;;  %v1100_v8 = vsub.s32 2, %v1958_v14 }
 0x6c6   : > { %v1101_v59 = vrot.slane %v1964_v16, %v1100_v8 }
 0x6c7   : > { %1428 = vmatpush3.bf16.msra.mxu1 %v1520_v49 }
 0x74a   : > { %v1002_v25 = vpop.xlane.xlu1 %1001 }
 0x74b   : > { %v1003_v26 = vmul.f32 0.03125, %v1002_v25 }
 0x74d   : > { %v1004_v27 = vsub.f32 %v1968_v22, %v1003_v26 }
 0x74f   : > { %v1005_v28 = vmul.f32 %v1004_v27, %v1004_v27  ;;  %v1020_v42 = vmul.f32 %v1019_v41, %v1004_v27 }
 0x751   : > { %v1006_v29 = vsel %vm375_vm0, %v1005_v28, 0.0 }
 0x752   : > { %1007 = vadd.xlane.f32.xlu0 %v1006_v29 }
 0x7df   : > { %v1008_v33 = vpop.xlane.xlu0 %1007 }
 0x7e0   : > { %v1009_v34 = vmul.f32 0.032258064, %v1008_v33 }
 0x7e2   : > { %1541 = vrsqrt.f32 %v1009_v34  ;;  %vm1012_vm8 = vcmp.eq.f32.partialorder %v1009_v34, inf  ;;  %v1015_v37 = vand.u32 2147483648, %v1009_v34  ;;  %vm1014_vm9 = vcmp.eq.f32.partialorder %v1009_v34, 0.0 }
 0x7ec   : > { %v1542_v35 = vpop.eup %1541 }
 0x7ed   : > { %v1011_v36 = vmul.f32 %v1542_v35, %v1009_v34 }
 0x7ef   : > { %v1013_v38 = vsel %vm1012_vm8, %v1009_v34, %v1011_v36 }
 0x7f0   : > { %v1016_v39 = vsel %vm1014_vm9, %v1015_v37, %v1013_v38 }
 0x7f1   : > { %v1017_v40 = vadd.f32 1e-05, %v1016_v39 }
 0x7f3   : > { %1543 = vrcp.f32 %v1017_v40 }
 0x7fd   : > { %v1544_v43 = vpop.eup %1543 }
 0x7fe   : > { %v1021_v45 = vmul.f32 %v1544_v43, %v1020_v42 }
 0x800   : > { %v1023_v46 = vadd.f32 %v1022_v44, %v1021_v45 }
 0x802   : > { %v1024_v47 = vpack.c.bf16 %v1023_v46, %v1023_v46 }
 0x804   : > { %1418 = vmatmul.mubr.msk.bf16.vlgmr.msra.gmra.mrb[20].mxu0 %vm375_vm0, %v1024_v47 }
 0x8d7   : > { %v1082_v52 = vpop.f32.mrb[20].mxu0 }
 0x8d8   : > { %v1083_v53 = vadd.f32 %v1082_v52, %v1032_v51  ;;  %v1419_v54 = vpop.f32.mrb[21].mxu0 }
 0x8d9   : > { %v1085_v55 = vpop.f32.mrb[22].mxu0 }
 0x8da   : > { %v1088_v56 = vmax.f32 %v1083_v53, 0.0  ;;  %v1420_v57 = vpop.f32.mrb[23].mxu0 }
 0x8dc   : > { %v1089_v58 = vpack.c.bf16 %v1088_v56, %v1088_v56 }
 0x8de   : > { %1430 = vmatmul.mubr.msk.bf16.vlgmr.msra.gmra.mrb[20].mxu1 %vm1126_vm10, %v1089_v58 }
 0x9b1   : > { %v1164_v60 = vpop.f32.mrb[20].mxu1 }
 0x9b2   : > { %v1165_v61 = vadd.f32 %v1164_v60, %v1101_v59  ;;  %v1431_v62 = vpop.f32.mrb[21].mxu1 }
 0x9b3   : > { %v1167_v63 = vpop.f32.mrb[22].mxu1 }
 0x9b4   : > { %v1170_v1 = vadd.f32 %v1165_v61, %v1968_v22  ;;  %v1432_v2 = vpop.f32.mrb[23].mxu1 }
 0x9b6   : > { %1171 = vst.msk [vmem:[%s361_s14] sm:$0xff] %vm375_vm0, %v1170_v1 }
 0x9b7   : > { %1599 = shalt.err (!%p1596_p7)
}
 0x9b8   : > { %s1600_s25 = scalar_lea.hbm %s2001_s18, 128  ;;  %s1604_s29 = scalar_lea.hbm %s2053_s9, 256 }
 0x9b9   : > { %p1601_p8 = scmp.ne.s32.totalorder %s2001_s18, %s1600_s25  ;;  %p1605_p6 = scmp.lt.u32.totalorder %s2001_s18, %s2053_s9 }
 0x9ba   : > { %p1606_p10 = scmp.lt.u32.totalorder %s1604_s29, %s1600_s25  ;;  %p1608_p9 = scmp.lt.u32.totalorder %s1600_s25, %s2001_s18 }
 0x9bb   : > { %p1602_p0 = pnand %p1601_p8, %p1767_p5 }
 0x9bc   : > { %p1607_p13 = por %p1606_p10, %p1605_p6 }
 0x9bd   : > { %p1603_p11 = pneg %p1602_p0 }
 0x9be   : > { %p1609_p12 = por %p1608_p9, %p1607_p13 }
 0x9c0   : > { %p1610_p1 = pnand %p1609_p12, %p1603_p11 }
 0x9c2   : > { %1613 = shalt.err (!%p1610_p1)
}
 0x9c3   : > { %1441 = dma.vmem_to_hbm [thread:$0]  (%p1767_p5), %s2003_s16, 128, %s2001_s18, %s1173_s13  }
 0x9c4 PF: > { %p1458_p2 = scmp.ge.s32.totalorder %s1656_s12, 2  ;;  %s1198_s23 = sand.u32 1, %s1644_s30  }
 0x9c5   : > { %p2066_p3 = scmp.ne.s32.totalorder %s2059_s20, 0  ;;  %s1199_s11 = scalar_lea.sflag [#allocation4], %s1198_s23 }
 0x9c7   : > { %p1451_p4 = pnand %p1458_p2, %p2066_p3 }
 0x9c9   : > { %1639 = dma.done.wait (!%p1451_p4), %s1199_s11, 128  }
 0x9ca   : > { %1641 = vsyncadd (!%p1451_p4), %s1199_s11, 4294967168  ;;  %s2067_s17 = sld [smem:[#allocation11_spill]]  ;;  %s2068_s11 = sld [smem:[#allocation12_spill]] }
 0x9cb   : > { %p21_p7 = scmp.ge.s32.totalorder %s1754_s15, 4   ;;  %s2069_s30 = smov %s1648_s10 }
 0x9cc   : > { %s2071_s12 = smov %s1754_s15 }
 0x9cd   :  { %23 = sbr.rel (!%p21_p7) target bundleno = 5 (0x5), region = 104 }
 0x9d0   : > { %s2070_s10 = smov %s2067_s17 }
 0x9d4   :  { %1204 = vsyncpa [#allocation3], 1 }
 0x9d5   :  { %1206 = vsyncpa [#allocation3 + $0x1], 1 }
 0x9d6   :  { %1207 = vsyncpa [#allocation4], 1 }
 0x9d7   :  { %1209 = vsyncpa [#allocation4 + $0x1], 1 }
 0x9d8   :  { %1210 = vsyncpa [#allocation5], 1 }
 0x9d9   :  { %1212 = vsyncpa [#allocation5 + $0x1], 1 }

</bundles_post_ra>
